<compile_context>
chip_gen: v6e
topology: v6e:2x2x1
jax: 0.10.0
libtpu: 0.0.40
codegen_flags: <defaults>
</compile_context>

<pallas_src>
import functools

import jax
import jax.numpy as jnp
from jax import lax
from jax.experimental import pallas as pl
from jax.experimental.pallas import tpu as pltpu


def _vmem_limit_bytes():
    cap = 64 * 1024 * 1024
    try:
        info = pltpu.get_tpu_info()
        cap = int(getattr(info, "vmem_capacity_bytes", cap))
    except Exception:
        pass
    return max(32 * 1024 * 1024, (cap * 3) // 4)


def _pick_row_tile(ho, wo, cin, cout, vmem_limit):
    """Largest divisor t of ho such that the per-step working set fits ~half the
    VMEM budget, the im2col unroll stays bounded, and the output tile keeps an
    (8,128)-friendly sublane count."""
    kk = 9
    cap = min(16, max(1, 1024 // max(wo, 1)))

    def fits(t):
        m = t * wo
        est = (2 * 4 * (t + 1) * (wo + 1) * cin * 2       # phase-split blocks (double buffered)
               + 2 * 2 * (wo + 1) * cin * 2               # halo blocks
               + m * kk * cin * 2                         # im2col scratch (bf16)
               + 2 * m * cout * 4                         # output blocks
               + m * cout * 4                             # matmul result live values
               + 2 * (kk * cin * cout * 2 + cout * 4))    # weights + bias
        return est <= vmem_limit // 2

    candidates = [t for t in range(1, ho + 1)
                  if ho % t == 0 and ((t * wo) % 8 == 0 or t == ho)]
    good = [t for t in candidates if t <= cap and fits(t)]
    if good:
        return max(good)
    small = [t for t in candidates if fits(t)]
    return min(small) if small else min(candidates)


def _make_conv_kernel(toh, wo, kh_n, kw_n, cin, cout, with_stats):
    """3x3 / stride-2 conv + bias + LeakyReLU(0.2) for one (n, row-tile) block.

    The phase-split input tile is gathered per tap into a VMEM im2col scratch of
    shape (toh*wo, 9*cin) so the whole tile is ONE MXU matmul with M = toh*wo and
    K = 9*cin (instead of 9*toh tiny matmuls with M = wo and K = cin).

      xs_ref : (1, 4, toh, wo+1, cin)  H/W phase-split rows, phase = 2*p + q (bf16)
      xh_ref : (1, 2, 1,  wo+1, cin)   phase p=0 halo row (local row == toh) (bf16)
      w_ref  : (9*cin, cout)           tap-major packed weights              (bf16)
      b_ref  : (1, cout)               bias                                  (f32)
      o_ref  : (1, toh*wo, cout)       activation output
      stats_ref (norm only): (1, 1, 2, cout)  per-tile [sum, sumsq]          (f32)
      lhs_ref: (toh*wo, 9*cin)         im2col scratch                        (bf16)
    """
    # TODO(synk): keep a per-tap-matmul path (K = Cin) for Cin >= 128 where K is
    # already MXU-dense and the im2col copy is pure overhead.

    def fill_lhs(xs_ref, xh_ref, lhs_ref):
        for kh in range(kh_n):
            p, dh = kh % 2, kh // 2
            for kw in range(kw_n):
                q, dw = kw % 2, kw // 2
                col = (kh * kw_n + kw) * cin
                for oh in range(toh):
                    i = oh + dh
                    if i < toh:
                        row = xs_ref[0, 2 * p + q, i, dw:dw + wo, :]
                    else:                       # last output row of kh=2 tap
                        row = xh_ref[0, q, 0, dw:dw + wo, :]
                    lhs_ref[oh * wo:(oh + 1) * wo, col:col + cin] = row

    def conv_tile(xs_ref, xh_ref, w_ref, b_ref, lhs_ref):
        fill_lhs(xs_ref, xh_ref, lhs_ref)
        acc = jnp.dot(lhs_ref[...], w_ref[...],
                      preferred_element_type=jnp.float32)       # (M, cout) f32
        act = acc + b_ref[...]
        return jnp.maximum(act, 0.2 * act)                      # LeakyReLU(0.2)

    if not with_stats:
        def kernel(xs_ref, xh_ref, w_ref, b_ref, o_ref, lhs_ref):
            act = conv_tile(xs_ref, xh_ref, w_ref, b_ref, lhs_ref)
            o_ref[0] = act.astype(o_ref.dtype)
        return kernel

    def kernel(xs_ref, xh_ref, w_ref, b_ref, o_ref, stats_ref, lhs_ref):
        act = conv_tile(xs_ref, xh_ref, w_ref, b_ref, lhs_ref)
        o_ref[0] = act.astype(o_ref.dtype)
        # per-tile partial batch statistics in f32; reduced in the wrapper
        stats_ref[0, 0, 0:1, :] = jnp.sum(act, axis=0, keepdims=True)
        stats_ref[0, 0, 1:2, :] = jnp.sum(act * act, axis=0, keepdims=True)

    return kernel


def _bn_apply_kernel(a_ref, scale_ref, shift_ref, o_ref):
    # y = act * scale + shift  (scale/shift fold mean/var/gamma/beta), f32 math
    x = a_ref[...].astype(jnp.float32)
    o_ref[...] = (x * scale_ref[...] + shift_ref[...]).astype(o_ref.dtype)


@functools.partial(jax.jit, static_argnames=("stride", "padding", "norm", "eps"))
def down_block(x, weight, bias, gamma=None, beta=None, *, stride=2, padding=1,
               norm=False, eps=1e-5):
    N, Cin, H, W = x.shape
    Cout, Cin_w, KH, KW = weight.shape
    assert Cin_w == Cin
    # specialized for the DownBlock defaults (3x3, stride 2, dilation 1)
    assert stride == 2 and KH == 3 and KW == 3
    # TODO(synk): generalize the phase-split layout to other strides / kernel
    # sizes / dilation.

    Ho = (H + 2 * padding - KH) // stride + 1
    Wo = (W + 2 * padding - KW) // stride + 1
    WO1 = Wo + 1
    KK = KH * KW

    vmem_limit = _vmem_limit_bytes()
    TOH = _pick_row_tile(Ho, Wo, Cin, Cout, vmem_limit)
    T = Ho // TOH
    M = TOH * Wo

    # ---------- host-side layout prep (one ~1x repack, no HBM im2col) ----------
    # TODO(synk): accept NHWC input directly to skip the NCHW->NHWC transpose.
    xn = jnp.transpose(x, (0, 2, 3, 1))                           # NHWC
    Hp, Wp = 2 * (Ho + 1), 2 * (Wo + 1)
    xp = jnp.pad(xn, ((0, 0), (padding, Hp - H - padding),
                      (padding, Wp - W - padding), (0, 0)))
    # combined H/W phase split: xs[n, 2p+q, i, j, c] = xp[n, 2i+p, 2j+q, c]
    xs = xp.reshape(N, Ho + 1, 2, WO1, 2, Cin).transpose(0, 2, 4, 1, 3, 5)
    xs = xs.reshape(N, 4, Ho + 1, WO1, Cin).astype(jnp.bfloat16)
    # phase p=0 halo row per tile (input phase-row t*TOH + TOH, used by kh=2)
    xh = xs[:, 0:2, TOH::TOH, :, :]                               # (N, 2, T, WO1, Cin)

    # tap-major packed weights: w_flat[(kh*KW + kw)*Cin + c, cout]
    w_flat = jnp.transpose(weight, (2, 3, 1, 0)).reshape(KK * Cin, Cout)
    w_flat = w_flat.astype(jnp.bfloat16)
    b2 = bias.astype(jnp.float32).reshape(1, Cout)

    # ---------- grid / specs ----------
    grid = (N, T)
    xs_spec = pl.BlockSpec((1, 4, TOH, WO1, Cin), lambda n, t: (n, 0, t, 0, 0))
    xh_spec = pl.BlockSpec((1, 2, 1, WO1, Cin), lambda n, t: (n, 0, t, 0, 0))
    w_spec = pl.BlockSpec((KK * Cin, Cout), lambda n, t: (0, 0))
    b_spec = pl.BlockSpec((1, Cout), lambda n, t: (0, 0))
    o_spec = pl.BlockSpec((1, M, Cout), lambda n, t: (n, t, 0))
    # TODO(synk): single-buffer the resident weight/bias blocks
    # (pipeline_mode=pl.Buffered(1)) once that path is validated on all gens.
    # TODO(synk): lane-pack the output as (Wo/2, 2*Cout) for Cout in {32, 64}
    # to regain unmasked stores without channel padding in HBM.

    scratch = [pltpu.VMEM((M, KK * Cin), jnp.bfloat16)]
    cparams = pltpu.CompilerParams(
        dimension_semantics=("parallel", "parallel"),
        vmem_limit_bytes=vmem_limit)
    flops = 2 * N * Ho * Wo * KK * Cin * Cout
    out_itemsize = 2 if norm else x.dtype.itemsize
    bytes_acc = int(xs.size * 2 + xh.size * 2 + w_flat.size * 2
                    + N * Ho * Wo * Cout * out_itemsize)
    cost = pl.CostEstimate(flops=flops, transcendentals=0,
                           bytes_accessed=bytes_acc)

    if not norm:
        kernel = _make_conv_kernel(TOH, Wo, KH, KW, Cin, Cout, with_stats=False)
        y = pl.pallas_call(
            kernel,
            out_shape=jax.ShapeDtypeStruct((N, Ho * Wo, Cout), x.dtype),
            grid=grid,
            in_specs=[xs_spec, xh_spec, w_spec, b_spec],
            out_specs=o_spec,
            scratch_shapes=scratch,
            compiler_params=cparams,
            cost_estimate=cost,
        )(xs, xh, w_flat, b2)
        # TODO(synk): return NHWC (or emit NCHW from the kernel when Wo%128==0)
        # to drop this final XLA transpose pass when the consumer layout allows.
        return jnp.transpose(y.reshape(N, Ho, Wo, Cout), (0, 3, 1, 2))

    # ---------- norm=True: two-pass BatchNorm (training-mode batch stats) ------
    assert gamma is not None and beta is not None
    kernel = _make_conv_kernel(TOH, Wo, KH, KW, Cin, Cout, with_stats=True)
    stats_spec = pl.BlockSpec((1, 1, 2, Cout), lambda n, t: (n, t, 0, 0))
    act, stats = pl.pallas_call(
        kernel,
        out_shape=(jax.ShapeDtypeStruct((N, Ho * Wo, Cout), jnp.bfloat16),
                   jax.ShapeDtypeStruct((N, T, 2, Cout), jnp.float32)),
        grid=grid,
        in_specs=[xs_spec, xh_spec, w_spec, b_spec],
        out_specs=(o_spec, stats_spec),
        scratch_shapes=scratch,
        compiler_params=cparams,
        cost_estimate=cost,
    )(xs, xh, w_flat, b2)

    # finalize batch statistics (tiny (N*T, 2, Cout) reduction) and fold affine
    cnt = jnp.float32(N * Ho * Wo)
    mean = jnp.sum(stats[:, :, 0, :], axis=(0, 1)) / cnt
    var = jnp.maximum(jnp.sum(stats[:, :, 1, :], axis=(0, 1)) / cnt - mean * mean, 0.0)
    # TODO(synk): switch to a centered/Welford combine if |mean| >> std becomes
    # a concern for the E[x^2]-E[x]^2 formulation.
    inv = lax.rsqrt(var + eps)
    g = gamma.astype(jnp.float32)
    scale = (g * inv).reshape(1, Cout)
    shift = (beta.astype(jnp.float32) - mean * g * inv).reshape(1, Cout)

    # pass 2: tiled elementwise normalization (reads bf16 intermediate)
    y = pl.pallas_call(
        _bn_apply_kernel,
        out_shape=jax.ShapeDtypeStruct((N, Ho * Wo, Cout), x.dtype),
        grid=grid,
        in_specs=[o_spec, b_spec, b_spec],
        out_specs=o_spec,
        compiler_params=cparams,
    )(act, scale, shift)
    # TODO(synk): BatchNorm running_mean/running_var (eval mode) is not tracked;
    # this matches the module in training mode only.
    return jnp.transpose(y.reshape(N, Ho, Wo, Cout), (0, 3, 1, 2))


if __name__ == "__main__":
    key = jax.random.PRNGKey(0)
    k_x, k_w, k_b, k_g, k_be = jax.random.split(key, 5)

    N, Cin, H, W = 2, 4, 16, 16
    Cout, KH, KW = 8, 3, 3

    x = jax.random.normal(k_x, (N, Cin, H, W), jnp.float32)
    fan_in = Cin * KH * KW
    weight = jax.random.normal(k_w, (Cout, Cin, KH, KW), jnp.float32) / jnp.sqrt(fan_in)
    bias = 0.1 * jax.random.normal(k_b, (Cout,), jnp.float32)
    gamma = 1.0 + 0.1 * jax.random.normal(k_g, (Cout,), jnp.float32)
    beta = 0.1 * jax.random.normal(k_be, (Cout,), jnp.float32)

    out = jax.block_until_ready(down_block(x, weight, bias, norm=False))
    out_bn = jax.block_until_ready(down_block(x, weight, bias, gamma, beta, norm=True))

    # reference with the same bf16-rounded operands and f32 accumulation
    xb = x.astype(jnp.bfloat16).astype(jnp.float32)
    wb = weight.astype(jnp.bfloat16).astype(jnp.float32)
    ref = lax.conv_general_dilated(
        xb, wb, window_strides=(2, 2), padding=((1, 1), (1, 1)),
        dimension_numbers=("NCHW", "OIHW", "NCHW"),
        precision=lax.Precision.HIGHEST)
    ref = ref + bias.reshape(1, -1, 1, 1)
    ref = jnp.where(ref > 0, ref, 0.2 * ref)

    assert out.shape == (N, Cout, H // 2, W // 2)
    assert jnp.allclose(out, ref, atol=1e-3, rtol=1e-3)

    mean = ref.mean(axis=(0, 2, 3), keepdims=True)
    var = ref.var(axis=(0, 2, 3), keepdims=True)
    ref_bn = ((ref - mean) * lax.rsqrt(var + 1e-5)
              * gamma.reshape(1, -1, 1, 1) + beta.reshape(1, -1, 1, 1))
    assert out_bn.shape == (N, Cout, H // 2, W // 2)
    # the norm-path intermediate is stored in bf16 -> tolerate ~bf16 rounding
    assert jnp.allclose(out_bn, ref_bn, atol=2e-2, rtol=2e-2)

    print("KERNEL_OK")
</pallas_src>

<mosaic_0001>
module attributes {stable_mosaic.version = 11 : i64} {
  func.func @kernel(%arg0: i32, %arg1: i32, %arg2: memref<1x4x8x9x4xbf16, #tpu.memory_space<vmem>>, %arg3: memref<1x2x1x9x4xbf16, #tpu.memory_space<vmem>>, %arg4: memref<36x8xbf16, #tpu.memory_space<vmem>>, %arg5: memref<1x8xf32, #tpu.memory_space<vmem>>, %arg6: memref<1x64x8xf32, #tpu.memory_space<vmem>>, %arg7: memref<64x36xbf16, #tpu.memory_space<vmem>>) attributes {dimension_semantics = [#tpu.dimension_semantics<parallel>, #tpu.dimension_semantics<parallel>], iteration_bounds = array<i64: 2, 1>, scalar_prefetch = 0 : i64, scratch_operands = 1 : i64, tpu.core_type = #tpu.core_type<tc>, window_params = [{transform_indices = @transform_0, window_bounds = array<i64: 1, 4, 8, 9, 4>}, {transform_indices = @transform_1, window_bounds = array<i64: 1, 2, 1, 9, 4>}, {pipeline_mode = #tpu.pipeline_mode<synchronous>, transform_indices = @transform_2, window_bounds = array<i64: 36, 8>}, {pipeline_mode = #tpu.pipeline_mode<synchronous>, transform_indices = @transform_3, window_bounds = array<i64: 1, 8>}, {transform_indices = @transform_4, window_bounds = array<i64: 1, 64, 8>}]} {
    %c0 = arith.constant 0 : index
    %c0_0 = arith.constant 0 : index
    %c0_1 = arith.constant 0 : index
    %c0_2 = arith.constant 0 : index
    %c0_3 = arith.constant 0 : index
    %0 = vector.load %arg2[%c0, %c0_0, %c0_1, %c0_2, %c0_3] : memref<1x4x8x9x4xbf16, #tpu.memory_space<vmem>>, vector<1x1x1x8x4xbf16>
    %1 = vector.shape_cast %0 : vector<1x1x1x8x4xbf16> to vector<8x4xbf16>
    %c0_4 = arith.constant 0 : index
    %c0_5 = arith.constant 0 : index
    %2 = vector.load %arg7[%c0_4, %c0_5] : memref<64x36xbf16, #tpu.memory_space<vmem>>, vector<8x4xbf16>
    tpu.vector_store %arg7[%c0_4, %c0_5], %1 {strides = array<i32>} : memref<64x36xbf16, #tpu.memory_space<vmem>>, vector<8x4xbf16>,
    %c0_6 = arith.constant 0 : index
    %c0_7 = arith.constant 0 : index
    %c1 = arith.constant 1 : index
    %c0_8 = arith.constant 0 : index
    %c0_9 = arith.constant 0 : index
    %3 = vector.load %arg2[%c0_6, %c0_7, %c1, %c0_8, %c0_9] : memref<1x4x8x9x4xbf16, #tpu.memory_space<vmem>>, vector<1x1x1x8x4xbf16>
    %4 = vector.shape_cast %3 : vector<1x1x1x8x4xbf16> to vector<8x4xbf16>
    %c8 = arith.constant 8 : index
    %c0_10 = arith.constant 0 : index
    %5 = vector.load %arg7[%c8, %c0_10] : memref<64x36xbf16, #tpu.memory_space<vmem>>, vector<8x4xbf16>
    tpu.vector_store %arg7[%c8, %c0_10], %4 {strides = array<i32>} : memref<64x36xbf16, #tpu.memory_space<vmem>>, vector<8x4xbf16>,
    %c0_11 = arith.constant 0 : index
    %c0_12 = arith.constant 0 : index
    %c2 = arith.constant 2 : index
    %c0_13 = arith.constant 0 : index
    %c0_14 = arith.constant 0 : index
    %6 = vector.load %arg2[%c0_11, %c0_12, %c2, %c0_13, %c0_14] : memref<1x4x8x9x4xbf16, #tpu.memory_space<vmem>>, vector<1x1x1x8x4xbf16>
    %7 = vector.shape_cast %6 : vector<1x1x1x8x4xbf16> to vector<8x4xbf16>
    %c16 = arith.constant 16 : index
    %c0_15 = arith.constant 0 : index
    %8 = vector.load %arg7[%c16, %c0_15] : memref<64x36xbf16, #tpu.memory_space<vmem>>, vector<8x4xbf16>
    tpu.vector_store %arg7[%c16, %c0_15], %7 {strides = array<i32>} : memref<64x36xbf16, #tpu.memory_space<vmem>>, vector<8x4xbf16>,
    %c0_16 = arith.constant 0 : index
    %c0_17 = arith.constant 0 : index
    %c3 = arith.constant 3 : index
    %c0_18 = arith.constant 0 : index
    %c0_19 = arith.constant 0 : index
    %9 = vector.load %arg2[%c0_16, %c0_17, %c3, %c0_18, %c0_19] : memref<1x4x8x9x4xbf16, #tpu.memory_space<vmem>>, vector<1x1x1x8x4xbf16>
    %10 = vector.shape_cast %9 : vector<1x1x1x8x4xbf16> to vector<8x4xbf16>
    %c24 = arith.constant 24 : index
    %c0_20 = arith.constant 0 : index
    %11 = vector.load %arg7[%c24, %c0_20] : memref<64x36xbf16, #tpu.memory_space<vmem>>, vector<8x4xbf16>
    tpu.vector_store %arg7[%c24, %c0_20], %10 {strides = array<i32>} : memref<64x36xbf16, #tpu.memory_space<vmem>>, vector<8x4xbf16>,
    %c0_21 = arith.constant 0 : index
    %c0_22 = arith.constant 0 : index
    %c4 = arith.constant 4 : index
    %c0_23 = arith.constant 0 : index
    %c0_24 = arith.constant 0 : index
    %12 = vector.load %arg2[%c0_21, %c0_22, %c4, %c0_23, %c0_24] : memref<1x4x8x9x4xbf16, #tpu.memory_space<vmem>>, vector<1x1x1x8x4xbf16>
    %13 = vector.shape_cast %12 : vector<1x1x1x8x4xbf16> to vector<8x4xbf16>
    %c32 = arith.constant 32 : index
    %c0_25 = arith.constant 0 : index
    %14 = vector.load %arg7[%c32, %c0_25] : memref<64x36xbf16, #tpu.memory_space<vmem>>, vector<8x4xbf16>
    tpu.vector_store %arg7[%c32, %c0_25], %13 {strides = array<i32>} : memref<64x36xbf16, #tpu.memory_space<vmem>>, vector<8x4xbf16>,
    %c0_26 = arith.constant 0 : index
    %c0_27 = arith.constant 0 : index
    %c5 = arith.constant 5 : index
    %c0_28 = arith.constant 0 : index
    %c0_29 = arith.constant 0 : index
    %15 = vector.load %arg2[%c0_26, %c0_27, %c5, %c0_28, %c0_29] : memref<1x4x8x9x4xbf16, #tpu.memory_space<vmem>>, vector<1x1x1x8x4xbf16>
    %16 = vector.shape_cast %15 : vector<1x1x1x8x4xbf16> to vector<8x4xbf16>
    %c40 = arith.constant 40 : index
    %c0_30 = arith.constant 0 : index
    %17 = vector.load %arg7[%c40, %c0_30] : memref<64x36xbf16, #tpu.memory_space<vmem>>, vector<8x4xbf16>
    tpu.vector_store %arg7[%c40, %c0_30], %16 {strides = array<i32>} : memref<64x36xbf16, #tpu.memory_space<vmem>>, vector<8x4xbf16>,
    %c0_31 = arith.constant 0 : index
    %c0_32 = arith.constant 0 : index
    %c6 = arith.constant 6 : index
    %c0_33 = arith.constant 0 : index
    %c0_34 = arith.constant 0 : index
    %18 = vector.load %arg2[%c0_31, %c0_32, %c6, %c0_33, %c0_34] : memref<1x4x8x9x4xbf16, #tpu.memory_space<vmem>>, vector<1x1x1x8x4xbf16>
    %19 = vector.shape_cast %18 : vector<1x1x1x8x4xbf16> to vector<8x4xbf16>
    %c48 = arith.constant 48 : index
    %c0_35 = arith.constant 0 : index
    %20 = vector.load %arg7[%c48, %c0_35] : memref<64x36xbf16, #tpu.memory_space<vmem>>, vector<8x4xbf16>
    tpu.vector_store %arg7[%c48, %c0_35], %19 {strides = array<i32>} : memref<64x36xbf16, #tpu.memory_space<vmem>>, vector<8x4xbf16>,
    %c0_36 = arith.constant 0 : index
    %c0_37 = arith.constant 0 : index
    %c7 = arith.constant 7 : index
    %c0_38 = arith.constant 0 : index
    %c0_39 = arith.constant 0 : index
    %21 = vector.load %arg2[%c0_36, %c0_37, %c7, %c0_38, %c0_39] : memref<1x4x8x9x4xbf16, #tpu.memory_space<vmem>>, vector<1x1x1x8x4xbf16>
    %22 = vector.shape_cast %21 : vector<1x1x1x8x4xbf16> to vector<8x4xbf16>
    %c56 = arith.constant 56 : index
    %c0_40 = arith.constant 0 : index
    %23 = vector.load %arg7[%c56, %c0_40] : memref<64x36xbf16, #tpu.memory_space<vmem>>, vector<8x4xbf16>
    tpu.vector_store %arg7[%c56, %c0_40], %22 {strides = array<i32>} : memref<64x36xbf16, #tpu.memory_space<vmem>>, vector<8x4xbf16>,
    %c0_41 = arith.constant 0 : index
    %c1_42 = arith.constant 1 : index
    %c0_43 = arith.constant 0 : index
    %c0_44 = arith.constant 0 : index
    %c0_45 = arith.constant 0 : index
    %24 = vector.load %arg2[%c0_41, %c1_42, %c0_43, %c0_44, %c0_45] : memref<1x4x8x9x4xbf16, #tpu.memory_space<vmem>>, vector<1x1x1x8x4xbf16>
    %25 = vector.shape_cast %24 : vector<1x1x1x8x4xbf16> to vector<8x4xbf16>
    %c0_46 = arith.constant 0 : index
    %c4_47 = arith.constant 4 : index
    %26 = vector.load %arg7[%c0_46, %c4_47] : memref<64x36xbf16, #tpu.memory_space<vmem>>, vector<8x4xbf16>
    tpu.vector_store %arg7[%c0_46, %c4_47], %25 {strides = array<i32>} : memref<64x36xbf16, #tpu.memory_space<vmem>>, vector<8x4xbf16>,
    %c0_48 = arith.constant 0 : index
    %c1_49 = arith.constant 1 : index
    %c1_50 = arith.constant 1 : index
    %c0_51 = arith.constant 0 : index
    %c0_52 = arith.constant 0 : index
    %27 = vector.load %arg2[%c0_48, %c1_49, %c1_50, %c0_51, %c0_52] : memref<1x4x8x9x4xbf16, #tpu.memory_space<vmem>>, vector<1x1x1x8x4xbf16>
    %28 = vector.shape_cast %27 : vector<1x1x1x8x4xbf16> to vector<8x4xbf16>
    %c8_53 = arith.constant 8 : index
    %c4_54 = arith.constant 4 : index
    %29 = vector.load %arg7[%c8_53, %c4_54] : memref<64x36xbf16, #tpu.memory_space<vmem>>, vector<8x4xbf16>
    tpu.vector_store %arg7[%c8_53, %c4_54], %28 {strides = array<i32>} : memref<64x36xbf16, #tpu.memory_space<vmem>>, vector<8x4xbf16>,
    %c0_55 = arith.constant 0 : index
    %c1_56 = arith.constant 1 : index
    %c2_57 = arith.constant 2 : index
    %c0_58 = arith.constant 0 : index
    %c0_59 = arith.constant 0 : index
    %30 = vector.load %arg2[%c0_55, %c1_56, %c2_57, %c0_58, %c0_59] : memref<1x4x8x9x4xbf16, #tpu.memory_space<vmem>>, vector<1x1x1x8x4xbf16>
    %31 = vector.shape_cast %30 : vector<1x1x1x8x4xbf16> to vector<8x4xbf16>
    %c16_60 = arith.constant 16 : index
    %c4_61 = arith.constant 4 : index
    %32 = vector.load %arg7[%c16_60, %c4_61] : memref<64x36xbf16, #tpu.memory_space<vmem>>, vector<8x4xbf16>
    tpu.vector_store %arg7[%c16_60, %c4_61], %31 {strides = array<i32>} : memref<64x36xbf16, #tpu.memory_space<vmem>>, vector<8x4xbf16>,
    %c0_62 = arith.constant 0 : index
    %c1_63 = arith.constant 1 : index
    %c3_64 = arith.constant 3 : index
    %c0_65 = arith.constant 0 : index
    %c0_66 = arith.constant 0 : index
    %33 = vector.load %arg2[%c0_62, %c1_63, %c3_64, %c0_65, %c0_66] : memref<1x4x8x9x4xbf16, #tpu.memory_space<vmem>>, vector<1x1x1x8x4xbf16>
    %34 = vector.shape_cast %33 : vector<1x1x1x8x4xbf16> to vector<8x4xbf16>
    %c24_67 = arith.constant 24 : index
    %c4_68 = arith.constant 4 : index
    %35 = vector.load %arg7[%c24_67, %c4_68] : memref<64x36xbf16, #tpu.memory_space<vmem>>, vector<8x4xbf16>
    tpu.vector_store %arg7[%c24_67, %c4_68], %34 {strides = array<i32>} : memref<64x36xbf16, #tpu.memory_space<vmem>>, vector<8x4xbf16>,
    %c0_69 = arith.constant 0 : index
    %c1_70 = arith.constant 1 : index
    %c4_71 = arith.constant 4 : index
    %c0_72 = arith.constant 0 : index
    %c0_73 = arith.constant 0 : index
    %36 = vector.load %arg2[%c0_69, %c1_70, %c4_71, %c0_72, %c0_73] : memref<1x4x8x9x4xbf16, #tpu.memory_space<vmem>>, vector<1x1x1x8x4xbf16>
    %37 = vector.shape_cast %36 : vector<1x1x1x8x4xbf16> to vector<8x4xbf16>
    %c32_74 = arith.constant 32 : index
    %c4_75 = arith.constant 4 : index
    %38 = vector.load %arg7[%c32_74, %c4_75] : memref<64x36xbf16, #tpu.memory_space<vmem>>, vector<8x4xbf16>
    tpu.vector_store %arg7[%c32_74, %c4_75], %37 {strides = array<i32>} : memref<64x36xbf16, #tpu.memory_space<vmem>>, vector<8x4xbf16>,
    %c0_76 = arith.constant 0 : index
    %c1_77 = arith.constant 1 : index
    %c5_78 = arith.constant 5 : index
    %c0_79 = arith.constant 0 : index
    %c0_80 = arith.constant 0 : index
    %39 = vector.load %arg2[%c0_76, %c1_77, %c5_78, %c0_79, %c0_80] : memref<1x4x8x9x4xbf16, #tpu.memory_space<vmem>>, vector<1x1x1x8x4xbf16>
    %40 = vector.shape_cast %39 : vector<1x1x1x8x4xbf16> to vector<8x4xbf16>
    %c40_81 = arith.constant 40 : index
    %c4_82 = arith.constant 4 : index
    %41 = vector.load %arg7[%c40_81, %c4_82] : memref<64x36xbf16, #tpu.memory_space<vmem>>, vector<8x4xbf16>
    tpu.vector_store %arg7[%c40_81, %c4_82], %40 {strides = array<i32>} : memref<64x36xbf16, #tpu.memory_space<vmem>>, vector<8x4xbf16>,
    %c0_83 = arith.constant 0 : index
    %c1_84 = arith.constant 1 : index
    %c6_85 = arith.constant 6 : index
    %c0_86 = arith.constant 0 : index
    %c0_87 = arith.constant 0 : index
    %42 = vector.load %arg2[%c0_83, %c1_84, %c6_85, %c0_86, %c0_87] : memref<1x4x8x9x4xbf16, #tpu.memory_space<vmem>>, vector<1x1x1x8x4xbf16>
    %43 = vector.shape_cast %42 : vector<1x1x1x8x4xbf16> to vector<8x4xbf16>
    %c48_88 = arith.constant 48 : index
    %c4_89 = arith.constant 4 : index
    %44 = vector.load %arg7[%c48_88, %c4_89] : memref<64x36xbf16, #tpu.memory_space<vmem>>, vector<8x4xbf16>
    tpu.vector_store %arg7[%c48_88, %c4_89], %43 {strides = array<i32>} : memref<64x36xbf16, #tpu.memory_space<vmem>>, vector<8x4xbf16>,
    %c0_90 = arith.constant 0 : index
    %c1_91 = arith.constant 1 : index
    %c7_92 = arith.constant 7 : index
    %c0_93 = arith.constant 0 : index
    %c0_94 = arith.constant 0 : index
    %45 = vector.load %arg2[%c0_90, %c1_91, %c7_92, %c0_93, %c0_94] : memref<1x4x8x9x4xbf16, #tpu.memory_space<vmem>>, vector<1x1x1x8x4xbf16>
    %46 = vector.shape_cast %45 : vector<1x1x1x8x4xbf16> to vector<8x4xbf16>
    %c56_95 = arith.constant 56 : index
    %c4_96 = arith.constant 4 : index
    %47 = vector.load %arg7[%c56_95, %c4_96] : memref<64x36xbf16, #tpu.memory_space<vmem>>, vector<8x4xbf16>
    tpu.vector_store %arg7[%c56_95, %c4_96], %46 {strides = array<i32>} : memref<64x36xbf16, #tpu.memory_space<vmem>>, vector<8x4xbf16>,
    %c0_97 = arith.constant 0 : index
    %c0_98 = arith.constant 0 : index
    %c0_99 = arith.constant 0 : index
    %c1_100 = arith.constant 1 : index
    %c0_101 = arith.constant 0 : index
    %48 = vector.load %arg2[%c0_97, %c0_98, %c0_99, %c1_100, %c0_101] : memref<1x4x8x9x4xbf16, #tpu.memory_space<vmem>>, vector<1x1x1x8x4xbf16>
    %49 = vector.shape_cast %48 : vector<1x1x1x8x4xbf16> to vector<8x4xbf16>
    %c0_102 = arith.constant 0 : index
    %c8_103 = arith.constant 8 : index
    %50 = vector.load %arg7[%c0_102, %c8_103] : memref<64x36xbf16, #tpu.memory_space<vmem>>, vector<8x4xbf16>
    tpu.vector_store %arg7[%c0_102, %c8_103], %49 {strides = array<i32>} : memref<64x36xbf16, #tpu.memory_space<vmem>>, vector<8x4xbf16>,
    %c0_104 = arith.constant 0 : index
    %c0_105 = arith.constant 0 : index
    %c1_106 = arith.constant 1 : index
    %c1_107 = arith.constant 1 : index
    %c0_108 = arith.constant 0 : index
    %51 = vector.load %arg2[%c0_104, %c0_105, %c1_106, %c1_107, %c0_108] : memref<1x4x8x9x4xbf16, #tpu.memory_space<vmem>>, vector<1x1x1x8x4xbf16>
    %52 = vector.shape_cast %51 : vector<1x1x1x8x4xbf16> to vector<8x4xbf16>
    %c8_109 = arith.constant 8 : index
    %c8_110 = arith.constant 8 : index
    %53 = vector.load %arg7[%c8_109, %c8_110] : memref<64x36xbf16, #tpu.memory_space<vmem>>, vector<8x4xbf16>
    tpu.vector_store %arg7[%c8_109, %c8_110], %52 {strides = array<i32>} : memref<64x36xbf16, #tpu.memory_space<vmem>>, vector<8x4xbf16>,
    %c0_111 = arith.constant 0 : index
    %c0_112 = arith.constant 0 : index
    %c2_113 = arith.constant 2 : index
    %c1_114 = arith.constant 1 : index
    %c0_115 = arith.constant 0 : index
    %54 = vector.load %arg2[%c0_111, %c0_112, %c2_113, %c1_114, %c0_115] : memref<1x4x8x9x4xbf16, #tpu.memory_space<vmem>>, vector<1x1x1x8x4xbf16>
    %55 = vector.shape_cast %54 : vector<1x1x1x8x4xbf16> to vector<8x4xbf16>
    %c16_116 = arith.constant 16 : index
    %c8_117 = arith.constant 8 : index
    %56 = vector.load %arg7[%c16_116, %c8_117] : memref<64x36xbf16, #tpu.memory_space<vmem>>, vector<8x4xbf16>
    tpu.vector_store %arg7[%c16_116, %c8_117], %55 {strides = array<i32>} : memref<64x36xbf16, #tpu.memory_space<vmem>>, vector<8x4xbf16>,
    %c0_118 = arith.constant 0 : index
    %c0_119 = arith.constant 0 : index
    %c3_120 = arith.constant 3 : index
    %c1_121 = arith.constant 1 : index
    %c0_122 = arith.constant 0 : index
    %57 = vector.load %arg2[%c0_118, %c0_119, %c3_120, %c1_121, %c0_122] : memref<1x4x8x9x4xbf16, #tpu.memory_space<vmem>>, vector<1x1x1x8x4xbf16>
    %58 = vector.shape_cast %57 : vector<1x1x1x8x4xbf16> to vector<8x4xbf16>
    %c24_123 = arith.constant 24 : index
    %c8_124 = arith.constant 8 : index
    %59 = vector.load %arg7[%c24_123, %c8_124] : memref<64x36xbf16, #tpu.memory_space<vmem>>, vector<8x4xbf16>
    tpu.vector_store %arg7[%c24_123, %c8_124], %58 {strides = array<i32>} : memref<64x36xbf16, #tpu.memory_space<vmem>>, vector<8x4xbf16>,
    %c0_125 = arith.constant 0 : index
    %c0_126 = arith.constant 0 : index
    %c4_127 = arith.constant 4 : index
    %c1_128 = arith.constant 1 : index
    %c0_129 = arith.constant 0 : index
    %60 = vector.load %arg2[%c0_125, %c0_126, %c4_127, %c1_128, %c0_129] : memref<1x4x8x9x4xbf16, #tpu.memory_space<vmem>>, vector<1x1x1x8x4xbf16>
    %61 = vector.shape_cast %60 : vector<1x1x1x8x4xbf16> to vector<8x4xbf16>
    %c32_130 = arith.constant 32 : index
    %c8_131 = arith.constant 8 : index
    %62 = vector.load %arg7[%c32_130, %c8_131] : memref<64x36xbf16, #tpu.memory_space<vmem>>, vector<8x4xbf16>
    tpu.vector_store %arg7[%c32_130, %c8_131], %61 {strides = array<i32>} : memref<64x36xbf16, #tpu.memory_space<vmem>>, vector<8x4xbf16>,
    %c0_132 = arith.constant 0 : index
    %c0_133 = arith.constant 0 : index
    %c5_134 = arith.constant 5 : index
    %c1_135 = arith.constant 1 : index
    %c0_136 = arith.constant 0 : index
    %63 = vector.load %arg2[%c0_132, %c0_133, %c5_134, %c1_135, %c0_136] : memref<1x4x8x9x4xbf16, #tpu.memory_space<vmem>>, vector<1x1x1x8x4xbf16>
    %64 = vector.shape_cast %63 : vector<1x1x1x8x4xbf16> to vector<8x4xbf16>
    %c40_137 = arith.constant 40 : index
    %c8_138 = arith.constant 8 : index
    %65 = vector.load %arg7[%c40_137, %c8_138] : memref<64x36xbf16, #tpu.memory_space<vmem>>, vector<8x4xbf16>
    tpu.vector_store %arg7[%c40_137, %c8_138], %64 {strides = array<i32>} : memref<64x36xbf16, #tpu.memory_space<vmem>>, vector<8x4xbf16>,
    %c0_139 = arith.constant 0 : index
    %c0_140 = arith.constant 0 : index
    %c6_141 = arith.constant 6 : index
    %c1_142 = arith.constant 1 : index
    %c0_143 = arith.constant 0 : index
    %66 = vector.load %arg2[%c0_139, %c0_140, %c6_141, %c1_142, %c0_143] : memref<1x4x8x9x4xbf16, #tpu.memory_space<vmem>>, vector<1x1x1x8x4xbf16>
    %67 = vector.shape_cast %66 : vector<1x1x1x8x4xbf16> to vector<8x4xbf16>
    %c48_144 = arith.constant 48 : index
    %c8_145 = arith.constant 8 : index
    %68 = vector.load %arg7[%c48_144, %c8_145] : memref<64x36xbf16, #tpu.memory_space<vmem>>, vector<8x4xbf16>
    tpu.vector_store %arg7[%c48_144, %c8_145], %67 {strides = array<i32>} : memref<64x36xbf16, #tpu.memory_space<vmem>>, vector<8x4xbf16>,
    %c0_146 = arith.constant 0 : index
    %c0_147 = arith.constant 0 : index
    %c7_148 = arith.constant 7 : index
    %c1_149 = arith.constant 1 : index
    %c0_150 = arith.constant 0 : index
    %69 = vector.load %arg2[%c0_146, %c0_147, %c7_148, %c1_149, %c0_150] : memref<1x4x8x9x4xbf16, #tpu.memory_space<vmem>>, vector<1x1x1x8x4xbf16>
    %70 = vector.shape_cast %69 : vector<1x1x1x8x4xbf16> to vector<8x4xbf16>
    %c56_151 = arith.constant 56 : index
    %c8_152 = arith.constant 8 : index
    %71 = vector.load %arg7[%c56_151, %c8_152] : memref<64x36xbf16, #tpu.memory_space<vmem>>, vector<8x4xbf16>
    tpu.vector_store %arg7[%c56_151, %c8_152], %70 {strides = array<i32>} : memref<64x36xbf16, #tpu.memory_space<vmem>>, vector<8x4xbf16>,
    %c0_153 = arith.constant 0 : index
    %c2_154 = arith.constant 2 : index
    %c0_155 = arith.constant 0 : index
    %c0_156 = arith.constant 0 : index
    %c0_157 = arith.constant 0 : index
    %72 = vector.load %arg2[%c0_153, %c2_154, %c0_155, %c0_156, %c0_157] : memref<1x4x8x9x4xbf16, #tpu.memory_space<vmem>>, vector<1x1x1x8x4xbf16>
    %73 = vector.shape_cast %72 : vector<1x1x1x8x4xbf16> to vector<8x4xbf16>
    %c0_158 = arith.constant 0 : index
    %c12 = arith.constant 12 : index
    %74 = vector.load %arg7[%c0_158, %c12] : memref<64x36xbf16, #tpu.memory_space<vmem>>, vector<8x4xbf16>
    tpu.vector_store %arg7[%c0_158, %c12], %73 {strides = array<i32>} : memref<64x36xbf16, #tpu.memory_space<vmem>>, vector<8x4xbf16>,
    %c0_159 = arith.constant 0 : index
    %c2_160 = arith.constant 2 : index
    %c1_161 = arith.constant 1 : index
    %c0_162 = arith.constant 0 : index
    %c0_163 = arith.constant 0 : index
    %75 = vector.load %arg2[%c0_159, %c2_160, %c1_161, %c0_162, %c0_163] : memref<1x4x8x9x4xbf16, #tpu.memory_space<vmem>>, vector<1x1x1x8x4xbf16>
    %76 = vector.shape_cast %75 : vector<1x1x1x8x4xbf16> to vector<8x4xbf16>
    %c8_164 = arith.constant 8 : index
    %c12_165 = arith.constant 12 : index
    %77 = vector.load %arg7[%c8_164, %c12_165] : memref<64x36xbf16, #tpu.memory_space<vmem>>, vector<8x4xbf16>
    tpu.vector_store %arg7[%c8_164, %c12_165], %76 {strides = array<i32>} : memref<64x36xbf16, #tpu.memory_space<vmem>>, vector<8x4xbf16>,
    %c0_166 = arith.constant 0 : index
    %c2_167 = arith.constant 2 : index
    %c2_168 = arith.constant 2 : index
    %c0_169 = arith.constant 0 : index
    %c0_170 = arith.constant 0 : index
    %78 = vector.load %arg2[%c0_166, %c2_167, %c2_168, %c0_169, %c0_170] : memref<1x4x8x9x4xbf16, #tpu.memory_space<vmem>>, vector<1x1x1x8x4xbf16>
    %79 = vector.shape_cast %78 : vector<1x1x1x8x4xbf16> to vector<8x4xbf16>
    %c16_171 = arith.constant 16 : index
    %c12_172 = arith.constant 12 : index
    %80 = vector.load %arg7[%c16_171, %c12_172] : memref<64x36xbf16, #tpu.memory_space<vmem>>, vector<8x4xbf16>
    tpu.vector_store %arg7[%c16_171, %c12_172], %79 {strides = array<i32>} : memref<64x36xbf16, #tpu.memory_space<vmem>>, vector<8x4xbf16>,
    %c0_173 = arith.constant 0 : index
    %c2_174 = arith.constant 2 : index
    %c3_175 = arith.constant 3 : index
    %c0_176 = arith.constant 0 : index
    %c0_177 = arith.constant 0 : index
    %81 = vector.load %arg2[%c0_173, %c2_174, %c3_175, %c0_176, %c0_177] : memref<1x4x8x9x4xbf16, #tpu.memory_space<vmem>>, vector<1x1x1x8x4xbf16>
    %82 = vector.shape_cast %81 : vector<1x1x1x8x4xbf16> to vector<8x4xbf16>
    %c24_178 = arith.constant 24 : index
    %c12_179 = arith.constant 12 : index
    %83 = vector.load %arg7[%c24_178, %c12_179] : memref<64x36xbf16, #tpu.memory_space<vmem>>, vector<8x4xbf16>
    tpu.vector_store %arg7[%c24_178, %c12_179], %82 {strides = array<i32>} : memref<64x36xbf16, #tpu.memory_space<vmem>>, vector<8x4xbf16>,
    %c0_180 = arith.constant 0 : index
    %c2_181 = arith.constant 2 : index
    %c4_182 = arith.constant 4 : index
    %c0_183 = arith.constant 0 : index
    %c0_184 = arith.constant 0 : index
    %84 = vector.load %arg2[%c0_180, %c2_181, %c4_182, %c0_183, %c0_184] : memref<1x4x8x9x4xbf16, #tpu.memory_space<vmem>>, vector<1x1x1x8x4xbf16>
    %85 = vector.shape_cast %84 : vector<1x1x1x8x4xbf16> to vector<8x4xbf16>
    %c32_185 = arith.constant 32 : index
    %c12_186 = arith.constant 12 : index
    %86 = vector.load %arg7[%c32_185, %c12_186] : memref<64x36xbf16, #tpu.memory_space<vmem>>, vector<8x4xbf16>
    tpu.vector_store %arg7[%c32_185, %c12_186], %85 {strides = array<i32>} : memref<64x36xbf16, #tpu.memory_space<vmem>>, vector<8x4xbf16>,
    %c0_187 = arith.constant 0 : index
    %c2_188 = arith.constant 2 : index
    %c5_189 = arith.constant 5 : index
    %c0_190 = arith.constant 0 : index
    %c0_191 = arith.constant 0 : index
    %87 = vector.load %arg2[%c0_187, %c2_188, %c5_189, %c0_190, %c0_191] : memref<1x4x8x9x4xbf16, #tpu.memory_space<vmem>>, vector<1x1x1x8x4xbf16>
    %88 = vector.shape_cast %87 : vector<1x1x1x8x4xbf16> to vector<8x4xbf16>
    %c40_192 = arith.constant 40 : index
    %c12_193 = arith.constant 12 : index
    %89 = vector.load %arg7[%c40_192, %c12_193] : memref<64x36xbf16, #tpu.memory_space<vmem>>, vector<8x4xbf16>
    tpu.vector_store %arg7[%c40_192, %c12_193], %88 {strides = array<i32>} : memref<64x36xbf16, #tpu.memory_space<vmem>>, vector<8x4xbf16>,
    %c0_194 = arith.constant 0 : index
    %c2_195 = arith.constant 2 : index
    %c6_196 = arith.constant 6 : index
    %c0_197 = arith.constant 0 : index
    %c0_198 = arith.constant 0 : index
    %90 = vector.load %arg2[%c0_194, %c2_195, %c6_196, %c0_197, %c0_198] : memref<1x4x8x9x4xbf16, #tpu.memory_space<vmem>>, vector<1x1x1x8x4xbf16>
    %91 = vector.shape_cast %90 : vector<1x1x1x8x4xbf16> to vector<8x4xbf16>
    %c48_199 = arith.constant 48 : index
    %c12_200 = arith.constant 12 : index
    %92 = vector.load %arg7[%c48_199, %c12_200] : memref<64x36xbf16, #tpu.memory_space<vmem>>, vector<8x4xbf16>
    tpu.vector_store %arg7[%c48_199, %c12_200], %91 {strides = array<i32>} : memref<64x36xbf16, #tpu.memory_space<vmem>>, vector<8x4xbf16>,
    %c0_201 = arith.constant 0 : index
    %c2_202 = arith.constant 2 : index
    %c7_203 = arith.constant 7 : index
    %c0_204 = arith.constant 0 : index
    %c0_205 = arith.constant 0 : index
    %93 = vector.load %arg2[%c0_201, %c2_202, %c7_203, %c0_204, %c0_205] : memref<1x4x8x9x4xbf16, #tpu.memory_space<vmem>>, vector<1x1x1x8x4xbf16>
    %94 = vector.shape_cast %93 : vector<1x1x1x8x4xbf16> to vector<8x4xbf16>
    %c56_206 = arith.constant 56 : index
    %c12_207 = arith.constant 12 : index
    %95 = vector.load %arg7[%c56_206, %c12_207] : memref<64x36xbf16, #tpu.memory_space<vmem>>, vector<8x4xbf16>
    tpu.vector_store %arg7[%c56_206, %c12_207], %94 {strides = array<i32>} : memref<64x36xbf16, #tpu.memory_space<vmem>>, vector<8x4xbf16>,
    %c0_208 = arith.constant 0 : index
    %c3_209 = arith.constant 3 : index
    %c0_210 = arith.constant 0 : index
    %c0_211 = arith.constant 0 : index
    %c0_212 = arith.constant 0 : index
    %96 = vector.load %arg2[%c0_208, %c3_209, %c0_210, %c0_211, %c0_212] : memref<1x4x8x9x4xbf16, #tpu.memory_space<vmem>>, vector<1x1x1x8x4xbf16>
    %97 = vector.shape_cast %96 : vector<1x1x1x8x4xbf16> to vector<8x4xbf16>
    %c0_213 = arith.constant 0 : index
    %c16_214 = arith.constant 16 : index
    %98 = vector.load %arg7[%c0_213, %c16_214] : memref<64x36xbf16, #tpu.memory_space<vmem>>, vector<8x4xbf16>
    tpu.vector_store %arg7[%c0_213, %c16_214], %97 {strides = array<i32>} : memref<64x36xbf16, #tpu.memory_space<vmem>>, vector<8x4xbf16>,
    %c0_215 = arith.constant 0 : index
    %c3_216 = arith.constant 3 : index
    %c1_217 = arith.constant 1 : index
    %c0_218 = arith.constant 0 : index
    %c0_219 = arith.constant 0 : index
    %99 = vector.load %arg2[%c0_215, %c3_216, %c1_217, %c0_218, %c0_219] : memref<1x4x8x9x4xbf16, #tpu.memory_space<vmem>>, vector<1x1x1x8x4xbf16>
    %100 = vector.shape_cast %99 : vector<1x1x1x8x4xbf16> to vector<8x4xbf16>
    %c8_220 = arith.constant 8 : index
    %c16_221 = arith.constant 16 : index
    %101 = vector.load %arg7[%c8_220, %c16_221] : memref<64x36xbf16, #tpu.memory_space<vmem>>, vector<8x4xbf16>
    tpu.vector_store %arg7[%c8_220, %c16_221], %100 {strides = array<i32>} : memref<64x36xbf16, #tpu.memory_space<vmem>>, vector<8x4xbf16>,
    %c0_222 = arith.constant 0 : index
    %c3_223 = arith.constant 3 : index
    %c2_224 = arith.constant 2 : index
    %c0_225 = arith.constant 0 : index
    %c0_226 = arith.constant 0 : index
    %102 = vector.load %arg2[%c0_222, %c3_223, %c2_224, %c0_225, %c0_226] : memref<1x4x8x9x4xbf16, #tpu.memory_space<vmem>>, vector<1x1x1x8x4xbf16>
    %103 = vector.shape_cast %102 : vector<1x1x1x8x4xbf16> to vector<8x4xbf16>
    %c16_227 = arith.constant 16 : index
    %c16_228 = arith.constant 16 : index
    %104 = vector.load %arg7[%c16_227, %c16_228] : memref<64x36xbf16, #tpu.memory_space<vmem>>, vector<8x4xbf16>
    tpu.vector_store %arg7[%c16_227, %c16_228], %103 {strides = array<i32>} : memref<64x36xbf16, #tpu.memory_space<vmem>>, vector<8x4xbf16>,
    %c0_229 = arith.constant 0 : index
    %c3_230 = arith.constant 3 : index
    %c3_231 = arith.constant 3 : index
    %c0_232 = arith.constant 0 : index
    %c0_233 = arith.constant 0 : index
    %105 = vector.load %arg2[%c0_229, %c3_230, %c3_231, %c0_232, %c0_233] : memref<1x4x8x9x4xbf16, #tpu.memory_space<vmem>>, vector<1x1x1x8x4xbf16>
    %106 = vector.shape_cast %105 : vector<1x1x1x8x4xbf16> to vector<8x4xbf16>
    %c24_234 = arith.constant 24 : index
    %c16_235 = arith.constant 16 : index
    %107 = vector.load %arg7[%c24_234, %c16_235] : memref<64x36xbf16, #tpu.memory_space<vmem>>, vector<8x4xbf16>
    tpu.vector_store %arg7[%c24_234, %c16_235], %106 {strides = array<i32>} : memref<64x36xbf16, #tpu.memory_space<vmem>>, vector<8x4xbf16>,
    %c0_236 = arith.constant 0 : index
    %c3_237 = arith.constant 3 : index
    %c4_238 = arith.constant 4 : index
    %c0_239 = arith.constant 0 : index
    %c0_240 = arith.constant 0 : index
    %108 = vector.load %arg2[%c0_236, %c3_237, %c4_238, %c0_239, %c0_240] : memref<1x4x8x9x4xbf16, #tpu.memory_space<vmem>>, vector<1x1x1x8x4xbf16>
    %109 = vector.shape_cast %108 : vector<1x1x1x8x4xbf16> to vector<8x4xbf16>
    %c32_241 = arith.constant 32 : index
    %c16_242 = arith.constant 16 : index
    %110 = vector.load %arg7[%c32_241, %c16_242] : memref<64x36xbf16, #tpu.memory_space<vmem>>, vector<8x4xbf16>
    tpu.vector_store %arg7[%c32_241, %c16_242], %109 {strides = array<i32>} : memref<64x36xbf16, #tpu.memory_space<vmem>>, vector<8x4xbf16>,
    %c0_243 = arith.constant 0 : index
    %c3_244 = arith.constant 3 : index
    %c5_245 = arith.constant 5 : index
    %c0_246 = arith.constant 0 : index
    %c0_247 = arith.constant 0 : index
    %111 = vector.load %arg2[%c0_243, %c3_244, %c5_245, %c0_246, %c0_247] : memref<1x4x8x9x4xbf16, #tpu.memory_space<vmem>>, vector<1x1x1x8x4xbf16>
    %112 = vector.shape_cast %111 : vector<1x1x1x8x4xbf16> to vector<8x4xbf16>
    %c40_248 = arith.constant 40 : index
    %c16_249 = arith.constant 16 : index
    %113 = vector.load %arg7[%c40_248, %c16_249] : memref<64x36xbf16, #tpu.memory_space<vmem>>, vector<8x4xbf16>
    tpu.vector_store %arg7[%c40_248, %c16_249], %112 {strides = array<i32>} : memref<64x36xbf16, #tpu.memory_space<vmem>>, vector<8x4xbf16>,
    %c0_250 = arith.constant 0 : index
    %c3_251 = arith.constant 3 : index
    %c6_252 = arith.constant 6 : index
    %c0_253 = arith.constant 0 : index
    %c0_254 = arith.constant 0 : index
    %114 = vector.load %arg2[%c0_250, %c3_251, %c6_252, %c0_253, %c0_254] : memref<1x4x8x9x4xbf16, #tpu.memory_space<vmem>>, vector<1x1x1x8x4xbf16>
    %115 = vector.shape_cast %114 : vector<1x1x1x8x4xbf16> to vector<8x4xbf16>
    %c48_255 = arith.constant 48 : index
    %c16_256 = arith.constant 16 : index
    %116 = vector.load %arg7[%c48_255, %c16_256] : memref<64x36xbf16, #tpu.memory_space<vmem>>, vector<8x4xbf16>
    tpu.vector_store %arg7[%c48_255, %c16_256], %115 {strides = array<i32>} : memref<64x36xbf16, #tpu.memory_space<vmem>>, vector<8x4xbf16>,
    %c0_257 = arith.constant 0 : index
    %c3_258 = arith.constant 3 : index
    %c7_259 = arith.constant 7 : index
    %c0_260 = arith.constant 0 : index
    %c0_261 = arith.constant 0 : index
    %117 = vector.load %arg2[%c0_257, %c3_258, %c7_259, %c0_260, %c0_261] : memref<1x4x8x9x4xbf16, #tpu.memory_space<vmem>>, vector<1x1x1x8x4xbf16>
    %118 = vector.shape_cast %117 : vector<1x1x1x8x4xbf16> to vector<8x4xbf16>
    %c56_262 = arith.constant 56 : index
    %c16_263 = arith.constant 16 : index
    %119 = vector.load %arg7[%c56_262, %c16_263] : memref<64x36xbf16, #tpu.memory_space<vmem>>, vector<8x4xbf16>
    tpu.vector_store %arg7[%c56_262, %c16_263], %118 {strides = array<i32>} : memref<64x36xbf16, #tpu.memory_space<vmem>>, vector<8x4xbf16>,
    %c0_264 = arith.constant 0 : index
    %c2_265 = arith.constant 2 : index
    %c0_266 = arith.constant 0 : index
    %c1_267 = arith.constant 1 : index
    %c0_268 = arith.constant 0 : index
    %120 = vector.load %arg2[%c0_264, %c2_265, %c0_266, %c1_267, %c0_268] : memref<1x4x8x9x4xbf16, #tpu.memory_space<vmem>>, vector<1x1x1x8x4xbf16>
    %121 = vector.shape_cast %120 : vector<1x1x1x8x4xbf16> to vector<8x4xbf16>
    %c0_269 = arith.constant 0 : index
    %c20 = arith.constant 20 : index
    %122 = vector.load %arg7[%c0_269, %c20] : memref<64x36xbf16, #tpu.memory_space<vmem>>, vector<8x4xbf16>
    tpu.vector_store %arg7[%c0_269, %c20], %121 {strides = array<i32>} : memref<64x36xbf16, #tpu.memory_space<vmem>>, vector<8x4xbf16>,
    %c0_270 = arith.constant 0 : index
    %c2_271 = arith.constant 2 : index
    %c1_272 = arith.constant 1 : index
    %c1_273 = arith.constant 1 : index
    %c0_274 = arith.constant 0 : index
    %123 = vector.load %arg2[%c0_270, %c2_271, %c1_272, %c1_273, %c0_274] : memref<1x4x8x9x4xbf16, #tpu.memory_space<vmem>>, vector<1x1x1x8x4xbf16>
    %124 = vector.shape_cast %123 : vector<1x1x1x8x4xbf16> to vector<8x4xbf16>
    %c8_275 = arith.constant 8 : index
    %c20_276 = arith.constant 20 : index
    %125 = vector.load %arg7[%c8_275, %c20_276] : memref<64x36xbf16, #tpu.memory_space<vmem>>, vector<8x4xbf16>
    tpu.vector_store %arg7[%c8_275, %c20_276], %124 {strides = array<i32>} : memref<64x36xbf16, #tpu.memory_space<vmem>>, vector<8x4xbf16>,
    %c0_277 = arith.constant 0 : index
    %c2_278 = arith.constant 2 : index
    %c2_279 = arith.constant 2 : index
    %c1_280 = arith.constant 1 : index
    %c0_281 = arith.constant 0 : index
    %126 = vector.load %arg2[%c0_277, %c2_278, %c2_279, %c1_280, %c0_281] : memref<1x4x8x9x4xbf16, #tpu.memory_space<vmem>>, vector<1x1x1x8x4xbf16>
    %127 = vector.shape_cast %126 : vector<1x1x1x8x4xbf16> to vector<8x4xbf16>
    %c16_282 = arith.constant 16 : index
    %c20_283 = arith.constant 20 : index
    %128 = vector.load %arg7[%c16_282, %c20_283] : memref<64x36xbf16, #tpu.memory_space<vmem>>, vector<8x4xbf16>
    tpu.vector_store %arg7[%c16_282, %c20_283], %127 {strides = array<i32>} : memref<64x36xbf16, #tpu.memory_space<vmem>>, vector<8x4xbf16>,
    %c0_284 = arith.constant 0 : index
    %c2_285 = arith.constant 2 : index
    %c3_286 = arith.constant 3 : index
    %c1_287 = arith.constant 1 : index
    %c0_288 = arith.constant 0 : index
    %129 = vector.load %arg2[%c0_284, %c2_285, %c3_286, %c1_287, %c0_288] : memref<1x4x8x9x4xbf16, #tpu.memory_space<vmem>>, vector<1x1x1x8x4xbf16>
    %130 = vector.shape_cast %129 : vector<1x1x1x8x4xbf16> to vector<8x4xbf16>
    %c24_289 = arith.constant 24 : index
    %c20_290 = arith.constant 20 : index
    %131 = vector.load %arg7[%c24_289, %c20_290] : memref<64x36xbf16, #tpu.memory_space<vmem>>, vector<8x4xbf16>
    tpu.vector_store %arg7[%c24_289, %c20_290], %130 {strides = array<i32>} : memref<64x36xbf16, #tpu.memory_space<vmem>>, vector<8x4xbf16>,
    %c0_291 = arith.constant 0 : index
    %c2_292 = arith.constant 2 : index
    %c4_293 = arith.constant 4 : index
    %c1_294 = arith.constant 1 : index
    %c0_295 = arith.constant 0 : index
    %132 = vector.load %arg2[%c0_291, %c2_292, %c4_293, %c1_294, %c0_295] : memref<1x4x8x9x4xbf16, #tpu.memory_space<vmem>>, vector<1x1x1x8x4xbf16>
    %133 = vector.shape_cast %132 : vector<1x1x1x8x4xbf16> to vector<8x4xbf16>
    %c32_296 = arith.constant 32 : index
    %c20_297 = arith.constant 20 : index
    %134 = vector.load %arg7[%c32_296, %c20_297] : memref<64x36xbf16, #tpu.memory_space<vmem>>, vector<8x4xbf16>
    tpu.vector_store %arg7[%c32_296, %c20_297], %133 {strides = array<i32>} : memref<64x36xbf16, #tpu.memory_space<vmem>>, vector<8x4xbf16>,
    %c0_298 = arith.constant 0 : index
    %c2_299 = arith.constant 2 : index
    %c5_300 = arith.constant 5 : index
    %c1_301 = arith.constant 1 : index
    %c0_302 = arith.constant 0 : index
    %135 = vector.load %arg2[%c0_298, %c2_299, %c5_300, %c1_301, %c0_302] : memref<1x4x8x9x4xbf16, #tpu.memory_space<vmem>>, vector<1x1x1x8x4xbf16>
    %136 = vector.shape_cast %135 : vector<1x1x1x8x4xbf16> to vector<8x4xbf16>
    %c40_303 = arith.constant 40 : index
    %c20_304 = arith.constant 20 : index
    %137 = vector.load %arg7[%c40_303, %c20_304] : memref<64x36xbf16, #tpu.memory_space<vmem>>, vector<8x4xbf16>
    tpu.vector_store %arg7[%c40_303, %c20_304], %136 {strides = array<i32>} : memref<64x36xbf16, #tpu.memory_space<vmem>>, vector<8x4xbf16>,
    %c0_305 = arith.constant 0 : index
    %c2_306 = arith.constant 2 : index
    %c6_307 = arith.constant 6 : index
    %c1_308 = arith.constant 1 : index
    %c0_309 = arith.constant 0 : index
    %138 = vector.load %arg2[%c0_305, %c2_306, %c6_307, %c1_308, %c0_309] : memref<1x4x8x9x4xbf16, #tpu.memory_space<vmem>>, vector<1x1x1x8x4xbf16>
    %139 = vector.shape_cast %138 : vector<1x1x1x8x4xbf16> to vector<8x4xbf16>
    %c48_310 = arith.constant 48 : index
    %c20_311 = arith.constant 20 : index
    %140 = vector.load %arg7[%c48_310, %c20_311] : memref<64x36xbf16, #tpu.memory_space<vmem>>, vector<8x4xbf16>
    tpu.vector_store %arg7[%c48_310, %c20_311], %139 {strides = array<i32>} : memref<64x36xbf16, #tpu.memory_space<vmem>>, vector<8x4xbf16>,
    %c0_312 = arith.constant 0 : index
    %c2_313 = arith.constant 2 : index
    %c7_314 = arith.constant 7 : index
    %c1_315 = arith.constant 1 : index
    %c0_316 = arith.constant 0 : index
    %141 = vector.load %arg2[%c0_312, %c2_313, %c7_314, %c1_315, %c0_316] : memref<1x4x8x9x4xbf16, #tpu.memory_space<vmem>>, vector<1x1x1x8x4xbf16>
    %142 = vector.shape_cast %141 : vector<1x1x1x8x4xbf16> to vector<8x4xbf16>
    %c56_317 = arith.constant 56 : index
    %c20_318 = arith.constant 20 : index
    %143 = vector.load %arg7[%c56_317, %c20_318] : memref<64x36xbf16, #tpu.memory_space<vmem>>, vector<8x4xbf16>
    tpu.vector_store %arg7[%c56_317, %c20_318], %142 {strides = array<i32>} : memref<64x36xbf16, #tpu.memory_space<vmem>>, vector<8x4xbf16>,
    %c0_319 = arith.constant 0 : index
    %c0_320 = arith.constant 0 : index
    %c1_321 = arith.constant 1 : index
    %c0_322 = arith.constant 0 : index
    %c0_323 = arith.constant 0 : index
    %144 = vector.load %arg2[%c0_319, %c0_320, %c1_321, %c0_322, %c0_323] : memref<1x4x8x9x4xbf16, #tpu.memory_space<vmem>>, vector<1x1x1x8x4xbf16>
    %145 = vector.shape_cast %144 : vector<1x1x1x8x4xbf16> to vector<8x4xbf16>
    %c0_324 = arith.constant 0 : index
    %c24_325 = arith.constant 24 : index
    %146 = vector.load %arg7[%c0_324, %c24_325] : memref<64x36xbf16, #tpu.memory_space<vmem>>, vector<8x4xbf16>
    tpu.vector_store %arg7[%c0_324, %c24_325], %145 {strides = array<i32>} : memref<64x36xbf16, #tpu.memory_space<vmem>>, vector<8x4xbf16>,
    %c0_326 = arith.constant 0 : index
    %c0_327 = arith.constant 0 : index
    %c2_328 = arith.constant 2 : index
    %c0_329 = arith.constant 0 : index
    %c0_330 = arith.constant 0 : index
    %147 = vector.load %arg2[%c0_326, %c0_327, %c2_328, %c0_329, %c0_330] : memref<1x4x8x9x4xbf16, #tpu.memory_space<vmem>>, vector<1x1x1x8x4xbf16>
    %148 = vector.shape_cast %147 : vector<1x1x1x8x4xbf16> to vector<8x4xbf16>
    %c8_331 = arith.constant 8 : index
    %c24_332 = arith.constant 24 : index
    %149 = vector.load %arg7[%c8_331, %c24_332] : memref<64x36xbf16, #tpu.memory_space<vmem>>, vector<8x4xbf16>
    tpu.vector_store %arg7[%c8_331, %c24_332], %148 {strides = array<i32>} : memref<64x36xbf16, #tpu.memory_space<vmem>>, vector<8x4xbf16>,
    %c0_333 = arith.constant 0 : index
    %c0_334 = arith.constant 0 : index
    %c3_335 = arith.constant 3 : index
    %c0_336 = arith.constant 0 : index
    %c0_337 = arith.constant 0 : index
    %150 = vector.load %arg2[%c0_333, %c0_334, %c3_335, %c0_336, %c0_337] : memref<1x4x8x9x4xbf16, #tpu.memory_space<vmem>>, vector<1x1x1x8x4xbf16>
    %151 = vector.shape_cast %150 : vector<1x1x1x8x4xbf16> to vector<8x4xbf16>
    %c16_338 = arith.constant 16 : index
    %c24_339 = arith.constant 24 : index
    %152 = vector.load %arg7[%c16_338, %c24_339] : memref<64x36xbf16, #tpu.memory_space<vmem>>, vector<8x4xbf16>
    tpu.vector_store %arg7[%c16_338, %c24_339], %151 {strides = array<i32>} : memref<64x36xbf16, #tpu.memory_space<vmem>>, vector<8x4xbf16>,
    %c0_340 = arith.constant 0 : index
    %c0_341 = arith.constant 0 : index
    %c4_342 = arith.constant 4 : index
    %c0_343 = arith.constant 0 : index
    %c0_344 = arith.constant 0 : index
    %153 = vector.load %arg2[%c0_340, %c0_341, %c4_342, %c0_343, %c0_344] : memref<1x4x8x9x4xbf16, #tpu.memory_space<vmem>>, vector<1x1x1x8x4xbf16>
    %154 = vector.shape_cast %153 : vector<1x1x1x8x4xbf16> to vector<8x4xbf16>
    %c24_345 = arith.constant 24 : index
    %c24_346 = arith.constant 24 : index
    %155 = vector.load %arg7[%c24_345, %c24_346] : memref<64x36xbf16, #tpu.memory_space<vmem>>, vector<8x4xbf16>
    tpu.vector_store %arg7[%c24_345, %c24_346], %154 {strides = array<i32>} : memref<64x36xbf16, #tpu.memory_space<vmem>>, vector<8x4xbf16>,
    %c0_347 = arith.constant 0 : index
    %c0_348 = arith.constant 0 : index
    %c5_349 = arith.constant 5 : index
    %c0_350 = arith.constant 0 : index
    %c0_351 = arith.constant 0 : index
    %156 = vector.load %arg2[%c0_347, %c0_348, %c5_349, %c0_350, %c0_351] : memref<1x4x8x9x4xbf16, #tpu.memory_space<vmem>>, vector<1x1x1x8x4xbf16>
    %157 = vector.shape_cast %156 : vector<1x1x1x8x4xbf16> to vector<8x4xbf16>
    %c32_352 = arith.constant 32 : index
    %c24_353 = arith.constant 24 : index
    %158 = vector.load %arg7[%c32_352, %c24_353] : memref<64x36xbf16, #tpu.memory_space<vmem>>, vector<8x4xbf16>
    tpu.vector_store %arg7[%c32_352, %c24_353], %157 {strides = array<i32>} : memref<64x36xbf16, #tpu.memory_space<vmem>>, vector<8x4xbf16>,
    %c0_354 = arith.constant 0 : index
    %c0_355 = arith.constant 0 : index
    %c6_356 = arith.constant 6 : index
    %c0_357 = arith.constant 0 : index
    %c0_358 = arith.constant 0 : index
    %159 = vector.load %arg2[%c0_354, %c0_355, %c6_356, %c0_357, %c0_358] : memref<1x4x8x9x4xbf16, #tpu.memory_space<vmem>>, vector<1x1x1x8x4xbf16>
    %160 = vector.shape_cast %159 : vector<1x1x1x8x4xbf16> to vector<8x4xbf16>
    %c40_359 = arith.constant 40 : index
    %c24_360 = arith.constant 24 : index
    %161 = vector.load %arg7[%c40_359, %c24_360] : memref<64x36xbf16, #tpu.memory_space<vmem>>, vector<8x4xbf16>
    tpu.vector_store %arg7[%c40_359, %c24_360], %160 {strides = array<i32>} : memref<64x36xbf16, #tpu.memory_space<vmem>>, vector<8x4xbf16>,
    %c0_361 = arith.constant 0 : index
    %c0_362 = arith.constant 0 : index
    %c7_363 = arith.constant 7 : index
    %c0_364 = arith.constant 0 : index
    %c0_365 = arith.constant 0 : index
    %162 = vector.load %arg2[%c0_361, %c0_362, %c7_363, %c0_364, %c0_365] : memref<1x4x8x9x4xbf16, #tpu.memory_space<vmem>>, vector<1x1x1x8x4xbf16>
    %163 = vector.shape_cast %162 : vector<1x1x1x8x4xbf16> to vector<8x4xbf16>
    %c48_366 = arith.constant 48 : index
    %c24_367 = arith.constant 24 : index
    %164 = vector.load %arg7[%c48_366, %c24_367] : memref<64x36xbf16, #tpu.memory_space<vmem>>, vector<8x4xbf16>
    tpu.vector_store %arg7[%c48_366, %c24_367], %163 {strides = array<i32>} : memref<64x36xbf16, #tpu.memory_space<vmem>>, vector<8x4xbf16>,
    %c0_368 = arith.constant 0 : index
    %c0_369 = arith.constant 0 : index
    %c0_370 = arith.constant 0 : index
    %c0_371 = arith.constant 0 : index
    %c0_372 = arith.constant 0 : index
    %165 = vector.load %arg3[%c0_368, %c0_369, %c0_370, %c0_371, %c0_372] : memref<1x2x1x9x4xbf16, #tpu.memory_space<vmem>>, vector<1x1x1x8x4xbf16>
    %166 = vector.shape_cast %165 : vector<1x1x1x8x4xbf16> to vector<8x4xbf16>
    %c56_373 = arith.constant 56 : index
    %c24_374 = arith.constant 24 : index
    %167 = vector.load %arg7[%c56_373, %c24_374] : memref<64x36xbf16, #tpu.memory_space<vmem>>, vector<8x4xbf16>
    tpu.vector_store %arg7[%c56_373, %c24_374], %166 {strides = array<i32>} : memref<64x36xbf16, #tpu.memory_space<vmem>>, vector<8x4xbf16>,
    %c0_375 = arith.constant 0 : index
    %c1_376 = arith.constant 1 : index
    %c1_377 = arith.constant 1 : index
    %c0_378 = arith.constant 0 : index
    %c0_379 = arith.constant 0 : index
    %168 = vector.load %arg2[%c0_375, %c1_376, %c1_377, %c0_378, %c0_379] : memref<1x4x8x9x4xbf16, #tpu.memory_space<vmem>>, vector<1x1x1x8x4xbf16>
    %169 = vector.shape_cast %168 : vector<1x1x1x8x4xbf16> to vector<8x4xbf16>
    %c0_380 = arith.constant 0 : index
    %c28 = arith.constant 28 : index
    %170 = vector.load %arg7[%c0_380, %c28] : memref<64x36xbf16, #tpu.memory_space<vmem>>, vector<8x4xbf16>
    tpu.vector_store %arg7[%c0_380, %c28], %169 {strides = array<i32>} : memref<64x36xbf16, #tpu.memory_space<vmem>>, vector<8x4xbf16>,
    %c0_381 = arith.constant 0 : index
    %c1_382 = arith.constant 1 : index
    %c2_383 = arith.constant 2 : index
    %c0_384 = arith.constant 0 : index
    %c0_385 = arith.constant 0 : index
    %171 = vector.load %arg2[%c0_381, %c1_382, %c2_383, %c0_384, %c0_385] : memref<1x4x8x9x4xbf16, #tpu.memory_space<vmem>>, vector<1x1x1x8x4xbf16>
    %172 = vector.shape_cast %171 : vector<1x1x1x8x4xbf16> to vector<8x4xbf16>
    %c8_386 = arith.constant 8 : index
    %c28_387 = arith.constant 28 : index
    %173 = vector.load %arg7[%c8_386, %c28_387] : memref<64x36xbf16, #tpu.memory_space<vmem>>, vector<8x4xbf16>
    tpu.vector_store %arg7[%c8_386, %c28_387], %172 {strides = array<i32>} : memref<64x36xbf16, #tpu.memory_space<vmem>>, vector<8x4xbf16>,
    %c0_388 = arith.constant 0 : index
    %c1_389 = arith.constant 1 : index
    %c3_390 = arith.constant 3 : index
    %c0_391 = arith.constant 0 : index
    %c0_392 = arith.constant 0 : index
    %174 = vector.load %arg2[%c0_388, %c1_389, %c3_390, %c0_391, %c0_392] : memref<1x4x8x9x4xbf16, #tpu.memory_space<vmem>>, vector<1x1x1x8x4xbf16>
    %175 = vector.shape_cast %174 : vector<1x1x1x8x4xbf16> to vector<8x4xbf16>
    %c16_393 = arith.constant 16 : index
    %c28_394 = arith.constant 28 : index
    %176 = vector.load %arg7[%c16_393, %c28_394] : memref<64x36xbf16, #tpu.memory_space<vmem>>, vector<8x4xbf16>
    tpu.vector_store %arg7[%c16_393, %c28_394], %175 {strides = array<i32>} : memref<64x36xbf16, #tpu.memory_space<vmem>>, vector<8x4xbf16>,
    %c0_395 = arith.constant 0 : index
    %c1_396 = arith.constant 1 : index
    %c4_397 = arith.constant 4 : index
    %c0_398 = arith.constant 0 : index
    %c0_399 = arith.constant 0 : index
    %177 = vector.load %arg2[%c0_395, %c1_396, %c4_397, %c0_398, %c0_399] : memref<1x4x8x9x4xbf16, #tpu.memory_space<vmem>>, vector<1x1x1x8x4xbf16>
    %178 = vector.shape_cast %177 : vector<1x1x1x8x4xbf16> to vector<8x4xbf16>
    %c24_400 = arith.constant 24 : index
    %c28_401 = arith.constant 28 : index
    %179 = vector.load %arg7[%c24_400, %c28_401] : memref<64x36xbf16, #tpu.memory_space<vmem>>, vector<8x4xbf16>
    tpu.vector_store %arg7[%c24_400, %c28_401], %178 {strides = array<i32>} : memref<64x36xbf16, #tpu.memory_space<vmem>>, vector<8x4xbf16>,
    %c0_402 = arith.constant 0 : index
    %c1_403 = arith.constant 1 : index
    %c5_404 = arith.constant 5 : index
    %c0_405 = arith.constant 0 : index
    %c0_406 = arith.constant 0 : index
    %180 = vector.load %arg2[%c0_402, %c1_403, %c5_404, %c0_405, %c0_406] : memref<1x4x8x9x4xbf16, #tpu.memory_space<vmem>>, vector<1x1x1x8x4xbf16>
    %181 = vector.shape_cast %180 : vector<1x1x1x8x4xbf16> to vector<8x4xbf16>
    %c32_407 = arith.constant 32 : index
    %c28_408 = arith.constant 28 : index
    %182 = vector.load %arg7[%c32_407, %c28_408] : memref<64x36xbf16, #tpu.memory_space<vmem>>, vector<8x4xbf16>
    tpu.vector_store %arg7[%c32_407, %c28_408], %181 {strides = array<i32>} : memref<64x36xbf16, #tpu.memory_space<vmem>>, vector<8x4xbf16>,
    %c0_409 = arith.constant 0 : index
    %c1_410 = arith.constant 1 : index
    %c6_411 = arith.constant 6 : index
    %c0_412 = arith.constant 0 : index
    %c0_413 = arith.constant 0 : index
    %183 = vector.load %arg2[%c0_409, %c1_410, %c6_411, %c0_412, %c0_413] : memref<1x4x8x9x4xbf16, #tpu.memory_space<vmem>>, vector<1x1x1x8x4xbf16>
    %184 = vector.shape_cast %183 : vector<1x1x1x8x4xbf16> to vector<8x4xbf16>
    %c40_414 = arith.constant 40 : index
    %c28_415 = arith.constant 28 : index
    %185 = vector.load %arg7[%c40_414, %c28_415] : memref<64x36xbf16, #tpu.memory_space<vmem>>, vector<8x4xbf16>
    tpu.vector_store %arg7[%c40_414, %c28_415], %184 {strides = array<i32>} : memref<64x36xbf16, #tpu.memory_space<vmem>>, vector<8x4xbf16>,
    %c0_416 = arith.constant 0 : index
    %c1_417 = arith.constant 1 : index
    %c7_418 = arith.constant 7 : index
    %c0_419 = arith.constant 0 : index
    %c0_420 = arith.constant 0 : index
    %186 = vector.load %arg2[%c0_416, %c1_417, %c7_418, %c0_419, %c0_420] : memref<1x4x8x9x4xbf16, #tpu.memory_space<vmem>>, vector<1x1x1x8x4xbf16>
    %187 = vector.shape_cast %186 : vector<1x1x1x8x4xbf16> to vector<8x4xbf16>
    %c48_421 = arith.constant 48 : index
    %c28_422 = arith.constant 28 : index
    %188 = vector.load %arg7[%c48_421, %c28_422] : memref<64x36xbf16, #tpu.memory_space<vmem>>, vector<8x4xbf16>
    tpu.vector_store %arg7[%c48_421, %c28_422], %187 {strides = array<i32>} : memref<64x36xbf16, #tpu.memory_space<vmem>>, vector<8x4xbf16>,
    %c0_423 = arith.constant 0 : index
    %c1_424 = arith.constant 1 : index
    %c0_425 = arith.constant 0 : index
    %c0_426 = arith.constant 0 : index
    %c0_427 = arith.constant 0 : index
    %189 = vector.load %arg3[%c0_423, %c1_424, %c0_425, %c0_426, %c0_427] : memref<1x2x1x9x4xbf16, #tpu.memory_space<vmem>>, vector<1x1x1x8x4xbf16>
    %190 = vector.shape_cast %189 : vector<1x1x1x8x4xbf16> to vector<8x4xbf16>
    %c56_428 = arith.constant 56 : index
    %c28_429 = arith.constant 28 : index
    %191 = vector.load %arg7[%c56_428, %c28_429] : memref<64x36xbf16, #tpu.memory_space<vmem>>, vector<8x4xbf16>
    tpu.vector_store %arg7[%c56_428, %c28_429], %190 {strides = array<i32>} : memref<64x36xbf16, #tpu.memory_space<vmem>>, vector<8x4xbf16>,
    %c0_430 = arith.constant 0 : index
    %c0_431 = arith.constant 0 : index
    %c1_432 = arith.constant 1 : index
    %c1_433 = arith.constant 1 : index
    %c0_434 = arith.constant 0 : index
    %192 = vector.load %arg2[%c0_430, %c0_431, %c1_432, %c1_433, %c0_434] : memref<1x4x8x9x4xbf16, #tpu.memory_space<vmem>>, vector<1x1x1x8x4xbf16>
    %193 = vector.shape_cast %192 : vector<1x1x1x8x4xbf16> to vector<8x4xbf16>
    %c0_435 = arith.constant 0 : index
    %c32_436 = arith.constant 32 : index
    %194 = vector.load %arg7[%c0_435, %c32_436] : memref<64x36xbf16, #tpu.memory_space<vmem>>, vector<8x4xbf16>
    tpu.vector_store %arg7[%c0_435, %c32_436], %193 {strides = array<i32>} : memref<64x36xbf16, #tpu.memory_space<vmem>>, vector<8x4xbf16>,
    %c0_437 = arith.constant 0 : index
    %c0_438 = arith.constant 0 : index
    %c2_439 = arith.constant 2 : index
    %c1_440 = arith.constant 1 : index
    %c0_441 = arith.constant 0 : index
    %195 = vector.load %arg2[%c0_437, %c0_438, %c2_439, %c1_440, %c0_441] : memref<1x4x8x9x4xbf16, #tpu.memory_space<vmem>>, vector<1x1x1x8x4xbf16>
    %196 = vector.shape_cast %195 : vector<1x1x1x8x4xbf16> to vector<8x4xbf16>
    %c8_442 = arith.constant 8 : index
    %c32_443 = arith.constant 32 : index
    %197 = vector.load %arg7[%c8_442, %c32_443] : memref<64x36xbf16, #tpu.memory_space<vmem>>, vector<8x4xbf16>
    tpu.vector_store %arg7[%c8_442, %c32_443], %196 {strides = array<i32>} : memref<64x36xbf16, #tpu.memory_space<vmem>>, vector<8x4xbf16>,
    %c0_444 = arith.constant 0 : index
    %c0_445 = arith.constant 0 : index
    %c3_446 = arith.constant 3 : index
    %c1_447 = arith.constant 1 : index
    %c0_448 = arith.constant 0 : index
    %198 = vector.load %arg2[%c0_444, %c0_445, %c3_446, %c1_447, %c0_448] : memref<1x4x8x9x4xbf16, #tpu.memory_space<vmem>>, vector<1x1x1x8x4xbf16>
    %199 = vector.shape_cast %198 : vector<1x1x1x8x4xbf16> to vector<8x4xbf16>
    %c16_449 = arith.constant 16 : index
    %c32_450 = arith.constant 32 : index
    %200 = vector.load %arg7[%c16_449, %c32_450] : memref<64x36xbf16, #tpu.memory_space<vmem>>, vector<8x4xbf16>
    tpu.vector_store %arg7[%c16_449, %c32_450], %199 {strides = array<i32>} : memref<64x36xbf16, #tpu.memory_space<vmem>>, vector<8x4xbf16>,
    %c0_451 = arith.constant 0 : index
    %c0_452 = arith.constant 0 : index
    %c4_453 = arith.constant 4 : index
    %c1_454 = arith.constant 1 : index
    %c0_455 = arith.constant 0 : index
    %201 = vector.load %arg2[%c0_451, %c0_452, %c4_453, %c1_454, %c0_455] : memref<1x4x8x9x4xbf16, #tpu.memory_space<vmem>>, vector<1x1x1x8x4xbf16>
    %202 = vector.shape_cast %201 : vector<1x1x1x8x4xbf16> to vector<8x4xbf16>
    %c24_456 = arith.constant 24 : index
    %c32_457 = arith.constant 32 : index
    %203 = vector.load %arg7[%c24_456, %c32_457] : memref<64x36xbf16, #tpu.memory_space<vmem>>, vector<8x4xbf16>
    tpu.vector_store %arg7[%c24_456, %c32_457], %202 {strides = array<i32>} : memref<64x36xbf16, #tpu.memory_space<vmem>>, vector<8x4xbf16>,
    %c0_458 = arith.constant 0 : index
    %c0_459 = arith.constant 0 : index
    %c5_460 = arith.constant 5 : index
    %c1_461 = arith.constant 1 : index
    %c0_462 = arith.constant 0 : index
    %204 = vector.load %arg2[%c0_458, %c0_459, %c5_460, %c1_461, %c0_462] : memref<1x4x8x9x4xbf16, #tpu.memory_space<vmem>>, vector<1x1x1x8x4xbf16>
    %205 = vector.shape_cast %204 : vector<1x1x1x8x4xbf16> to vector<8x4xbf16>
    %c32_463 = arith.constant 32 : index
    %c32_464 = arith.constant 32 : index
    %206 = vector.load %arg7[%c32_463, %c32_464] : memref<64x36xbf16, #tpu.memory_space<vmem>>, vector<8x4xbf16>
    tpu.vector_store %arg7[%c32_463, %c32_464], %205 {strides = array<i32>} : memref<64x36xbf16, #tpu.memory_space<vmem>>, vector<8x4xbf16>,
    %c0_465 = arith.constant 0 : index
    %c0_466 = arith.constant 0 : index
    %c6_467 = arith.constant 6 : index
    %c1_468 = arith.constant 1 : index
    %c0_469 = arith.constant 0 : index
    %207 = vector.load %arg2[%c0_465, %c0_466, %c6_467, %c1_468, %c0_469] : memref<1x4x8x9x4xbf16, #tpu.memory_space<vmem>>, vector<1x1x1x8x4xbf16>
    %208 = vector.shape_cast %207 : vector<1x1x1x8x4xbf16> to vector<8x4xbf16>
    %c40_470 = arith.constant 40 : index
    %c32_471 = arith.constant 32 : index
    %209 = vector.load %arg7[%c40_470, %c32_471] : memref<64x36xbf16, #tpu.memory_space<vmem>>, vector<8x4xbf16>
    tpu.vector_store %arg7[%c40_470, %c32_471], %208 {strides = array<i32>} : memref<64x36xbf16, #tpu.memory_space<vmem>>, vector<8x4xbf16>,
    %c0_472 = arith.constant 0 : index
    %c0_473 = arith.constant 0 : index
    %c7_474 = arith.constant 7 : index
    %c1_475 = arith.constant 1 : index
    %c0_476 = arith.constant 0 : index
    %210 = vector.load %arg2[%c0_472, %c0_473, %c7_474, %c1_475, %c0_476] : memref<1x4x8x9x4xbf16, #tpu.memory_space<vmem>>, vector<1x1x1x8x4xbf16>
    %211 = vector.shape_cast %210 : vector<1x1x1x8x4xbf16> to vector<8x4xbf16>
    %c48_477 = arith.constant 48 : index
    %c32_478 = arith.constant 32 : index
    %212 = vector.load %arg7[%c48_477, %c32_478] : memref<64x36xbf16, #tpu.memory_space<vmem>>, vector<8x4xbf16>
    tpu.vector_store %arg7[%c48_477, %c32_478], %211 {strides = array<i32>} : memref<64x36xbf16, #tpu.memory_space<vmem>>, vector<8x4xbf16>,
    %c0_479 = arith.constant 0 : index
    %c0_480 = arith.constant 0 : index
    %c0_481 = arith.constant 0 : index
    %c1_482 = arith.constant 1 : index
    %c0_483 = arith.constant 0 : index
    %213 = vector.load %arg3[%c0_479, %c0_480, %c0_481, %c1_482, %c0_483] : memref<1x2x1x9x4xbf16, #tpu.memory_space<vmem>>, vector<1x1x1x8x4xbf16>
    %214 = vector.shape_cast %213 : vector<1x1x1x8x4xbf16> to vector<8x4xbf16>
    %c56_484 = arith.constant 56 : index
    %c32_485 = arith.constant 32 : index
    %215 = vector.load %arg7[%c56_484, %c32_485] : memref<64x36xbf16, #tpu.memory_space<vmem>>, vector<8x4xbf16>
    tpu.vector_store %arg7[%c56_484, %c32_485], %214 {strides = array<i32>} : memref<64x36xbf16, #tpu.memory_space<vmem>>, vector<8x4xbf16>,
    %c0_486 = arith.constant 0 : index
    %c0_487 = arith.constant 0 : index
    %216 = vector.load %arg7[%c0_486, %c0_487] : memref<64x36xbf16, #tpu.memory_space<vmem>>, vector<64x36xbf16>
    %c0_488 = arith.constant 0 : index
    %c0_489 = arith.constant 0 : index
    %217 = vector.load %arg4[%c0_488, %c0_489] : memref<36x8xbf16, #tpu.memory_space<vmem>>, vector<36x8xbf16>
    %cst = arith.constant dense<0.000000e+00> : vector<64x8xf32>
    %218 = tpu.matmul %216, %217, %cst {dimension_numbers = #tpu.dot_dimension_numbers<[1], [0], [0], [1], [0, 0, 1, 1], [], []>} : vector<64x36xbf16>, vector<36x8xbf16>, vector<64x8xf32> -> vector<64x8xf32>
    %c0_490 = arith.constant 0 : index
    %c0_491 = arith.constant 0 : index
    %219 = vector.load %arg5[%c0_490, %c0_491] : memref<1x8xf32, #tpu.memory_space<vmem>>, vector<1x8xf32>
    %220 = vector.broadcast %219 : vector<1x8xf32> to vector<64x8xf32>
    %221 = arith.addf %218, %220 : vector<64x8xf32>
    %cst_492 = arith.constant 2.000000e-01 : f32
    %222 = vector.broadcast %cst_492 : f32 to vector<64x8xf32>
    %223 = arith.mulf %222, %221 : vector<64x8xf32>
    %224 = arith.maximumf %221, %223 : vector<64x8xf32>
    %c0_493 = arith.constant 0 : index
    %c0_494 = arith.constant 0 : index
    %c0_495 = arith.constant 0 : index
    %225 = vector.load %arg6[%c0_493, %c0_494, %c0_495] : memref<1x64x8xf32, #tpu.memory_space<vmem>>, vector<1x64x8xf32>
    %226 = vector.shape_cast %225 : vector<1x64x8xf32> to vector<64x8xf32>
    %227 = vector.shape_cast %224 : vector<64x8xf32> to vector<1x64x8xf32>
    tpu.vector_store %arg6[%c0_493, %c0_494, %c0_495], %227 {strides = array<i32>} : memref<1x64x8xf32, #tpu.memory_space<vmem>>, vector<1x64x8xf32>,
    return
  }
  func.func @transform_0(%arg0: i32, %arg1: i32) -> (i32, i32, i32, i32, i32) {
    %c0_i32 = arith.constant 0 : i32
    %c0_i32_0 = arith.constant 0 : i32
    %c0_i32_1 = arith.constant 0 : i32
    %c0_i32_2 = arith.constant 0 : i32
    return %arg0, %c0_i32, %arg1, %c0_i32_0, %c0_i32_1 : i32, i32, i32, i32, i32
  }
  func.func @transform_1(%arg0: i32, %arg1: i32) -> (i32, i32, i32, i32, i32) {
    %c0_i32 = arith.constant 0 : i32
    %c0_i32_0 = arith.constant 0 : i32
    %c0_i32_1 = arith.constant 0 : i32
    %c0_i32_2 = arith.constant 0 : i32
    return %arg0, %c0_i32, %arg1, %c0_i32_0, %c0_i32_1 : i32, i32, i32, i32, i32
  }
  func.func @transform_2(%arg0: i32, %arg1: i32) -> (i32, i32) {
    %c0_i32 = arith.constant 0 : i32
    %c0_i32_0 = arith.constant 0 : i32
    %c0_i32_1 = arith.constant 0 : i32
    return %c0_i32, %c0_i32_0 : i32, i32
  }
  func.func @transform_3(%arg0: i32, %arg1: i32) -> (i32, i32) {
    %c0_i32 = arith.constant 0 : i32
    %c0_i32_0 = arith.constant 0 : i32
    %c0_i32_1 = arith.constant 0 : i32
    return %c0_i32, %c0_i32_0 : i32, i32
  }
  func.func @transform_4(%arg0: i32, %arg1: i32) -> (i32, i32, i32) {
    %c0_i32 = arith.constant 0 : i32
    %c0_i32_0 = arith.constant 0 : i32
    return %arg0, %arg1, %c0_i32 : i32, i32, i32
  }
}

</mosaic_0001>

<bundles_post_ra>
// kernel: down_block.1
= control target key start
LH: loop header
LB: loop body
LE: loop exit
PB: predicated region body
PF: predicated region fallthrough
CT: control target
= control target key end

     0   :  { %s2132_s15 = smov 0   ;;  %s2134_s16 = smov 0   ;;  %s2787_s0 = inlined_call_operand.vmem [shape: bf16[2,4,9,9,4], index: 0, kind: input, shape index: {}]   ;;  %s2788_s1 = inlined_call_operand.vmem [shape: bf16[2,2,1,9,4], index: 1, kind: input, shape index: {}]   ;;  %s2789_s2 = inlined_call_operand.vmem [shape: bf16[36,8], index: 2, kind: input, shape index: {}]   ;;  %s2790_s3 = inlined_call_operand.vmem [shape: f32[1,8], index: 3, kind: input, shape index: {}]   ;;  %s2791_s4 = inlined_call_operand.vmem [shape: f32[2,64,8], index: 4, kind: output, shape index: {}]  }
   0x1   :  { %s2136_s17 = smov 0   ;;  %s2138_s18 = smov 0  }
   0x2   :  { %s2140_s19 = smov 0  }
   0x3 LB: > { %s26_s20 = sadd.s32 1, %s2089_s18  ;;  %p42_p1 = scmp.ne.s32.totalorder %s2081_s16, %s2077_s15  ;;  %s2093_s19 = sphi %s2140_s19, %s14_s19   ;;  %s2089_s18 = sphi %s2138_s18, %s2797_s18   ;;  %s2085_s17 = sphi %s2136_s17, %s2796_s17   ;;  %s2081_s16 = sphi %s2134_s16, %s2795_s16   ;;  %s2077_s15 = sphi %s2132_s15, %s2794_s15  }
   0x4   : > { %p28_p0 = scmp.ge.s32.totalorder %s26_s20, 2  ;;  %p43_p2 = scmp.eq.s32.totalorder %s2093_s19, 0 }
   0x5   : > { %s35_s22 = sadd.s32 1, %s2081_s16  ;;  %p1799_p5 = scmp.ge.s32.totalorder %s2093_s19, 2 }
   0x6   : > { %s2799_s20 = smov (%p28_p0, %s26_s20), 0  ;;  %p44_p3 = por %p43_p2, %p42_p1 }
   0x7   : > { %s30_s21 = ssub.s32 %s2089_s18, %s2799_s20  ;;  %172 = sbr.rel (%p1799_p5) target bundleno = 66 (0x42), region = 24 }
   0x8   : > { %p33_p4 = scmp.eq.s32.totalorder %s30_s21, 0 }
   0xa   : > { %s2167_s23 = scalar_select %p33_p4, %s2081_s16, %s35_s22  }
   0xc   : > { %175 = sbr.rel (!%p44_p3) target bundleno = 66 (0x42), region = 28  ;;  %s177_s24 = sand.u32 (%p44_p3), 1, %s2081_s16  }
   0xd   : > { %s1951_s25 = smul.u32 (%p44_p3), 288, %s2089_s18  ;;  %s1800_s26 = sshll.u32 (%p44_p3), %s177_s24, 8 }
   0xe   : > { %s2177_s30 = scalar_lea.vmem (%p44_p3), [#allocation3], %s1800_s26   ;;  %s2179_s5 = smov (%p44_p3), 0  }
   0xf   : > { %s2175_s29 = scalar_lea.vmem (%p44_p3), %s2787_s0, %s1951_s25  }
  0x11 LB: >> { %v212_v0 = vld [vmem:[%s2175_s29] sm:$0xf]  ;;  %v214_v1 = vld [vmem:[%s2175_s29 + $0x4] sm:$0xf]  ;;  %v216_v2 = vld [vmem:[%s2175_s29 + $0x8] sm:$0xf]  ;;  %s2097_s5 = sphi %s2179_s5, %s206_s5  }
  0x12   : >> { %213 = vst [vmem:[%s2177_s30] sm:$0xf] %v212_v0  ;;  %215 = vst [vmem:[%s2177_s30 + $0x4] sm:$0xf] %v214_v1  ;;  %v218_v3 = vld [vmem:[%s2175_s29 + $0xc] sm:$0xf]  ;;  %s206_s5 = sadd.s32 1, %s2097_s5  }
  0x13   : >> { %217 = vst [vmem:[%s2177_s30 + $0x8] sm:$0xf] %v216_v2  ;;  %v220_v4 = vld [vmem:[%s2175_s29 + $0x10] sm:$0xf]  ;;  %v222_v5 = vld [vmem:[%s2175_s29 + $0x14] sm:$0xf] }
  0x14   : >> { %219 = vst [vmem:[%s2177_s30 + $0xc] sm:$0xf] %v218_v3  ;;  %221 = vst [vmem:[%s2177_s30 + $0x10] sm:$0xf] %v220_v4  ;;  %v224_v6 = vld [vmem:[%s2175_s29 + $0x18] sm:$0xf] }
  0x15   : >> { %223 = vst [vmem:[%s2177_s30 + $0x14] sm:$0xf] %v222_v5  ;;  %v226_v7 = vld [vmem:[%s2175_s29 + $0x1c] sm:$0xf]  ;;  %v228_v8 = vld [vmem:[%s2175_s29 + $0x20] sm:$0xf] }
  0x16   : >> { %225 = vst [vmem:[%s2177_s30 + $0x18] sm:$0xf] %v224_v6  ;;  %227 = vst [vmem:[%s2177_s30 + $0x1c] sm:$0xf] %v226_v7  ;;  %v230_v9 = vld [vmem:[%s2175_s29 + $0x24] sm:$0xf] }
  0x17   : >> { %229 = vst [vmem:[%s2177_s30 + $0x20] sm:$0xf] %v228_v8  ;;  %v232_v10 = vld [vmem:[%s2175_s29 + $0x28] sm:$0xf]  ;;  %v234_v11 = vld [vmem:[%s2175_s29 + $0x2c] sm:$0xf] }
  0x18   : >> { %231 = vst [vmem:[%s2177_s30 + $0x24] sm:$0xf] %v230_v9  ;;  %233 = vst [vmem:[%s2177_s30 + $0x28] sm:$0xf] %v232_v10  ;;  %v236_v12 = vld [vmem:[%s2175_s29 + $0x30] sm:$0xf] }
  0x19   : >> { %235 = vst [vmem:[%s2177_s30 + $0x2c] sm:$0xf] %v234_v11  ;;  %v238_v13 = vld [vmem:[%s2175_s29 + $0x34] sm:$0xf]  ;;  %v240_v14 = vld [vmem:[%s2175_s29 + $0x38] sm:$0xf] }
  0x1a   : >> { %237 = vst [vmem:[%s2177_s30 + $0x30] sm:$0xf] %v236_v12  ;;  %239 = vst [vmem:[%s2177_s30 + $0x34] sm:$0xf] %v238_v13  ;;  %v242_v15 = vld [vmem:[%s2175_s29 + $0x3c] sm:$0xf] }
  0x1b   : >> { %241 = vst [vmem:[%s2177_s30 + $0x38] sm:$0xf] %v240_v14  ;;  %v244_v16 = vld [vmem:[%s2175_s29 + $0x48] sm:$0xf]  ;;  %v246_v17 = vld [vmem:[%s2175_s29 + $0x4c] sm:$0xf] }
  0x1c   : >> { %243 = vst [vmem:[%s2177_s30 + $0x3c] sm:$0xf] %v242_v15  ;;  %245 = vst [vmem:[%s2177_s30 + $0x40] sm:$0xf] %v244_v16  ;;  %v248_v18 = vld [vmem:[%s2175_s29 + $0x50] sm:$0xf] }
  0x1d   : >> { %247 = vst [vmem:[%s2177_s30 + $0x44] sm:$0xf] %v246_v17  ;;  %v250_v19 = vld [vmem:[%s2175_s29 + $0x54] sm:$0xf]  ;;  %v252_v20 = vld [vmem:[%s2175_s29 + $0x58] sm:$0xf] }
  0x1e   : >> { %249 = vst [vmem:[%s2177_s30 + $0x48] sm:$0xf] %v248_v18  ;;  %251 = vst [vmem:[%s2177_s30 + $0x4c] sm:$0xf] %v250_v19  ;;  %v254_v21 = vld [vmem:[%s2175_s29 + $0x5c] sm:$0xf] }
  0x1f   : >> { %253 = vst [vmem:[%s2177_s30 + $0x50] sm:$0xf] %v252_v20  ;;  %v256_v22 = vld [vmem:[%s2175_s29 + $0x60] sm:$0xf]  ;;  %v258_v23 = vld [vmem:[%s2175_s29 + $0x64] sm:$0xf] }
  0x20   : >> { %255 = vst [vmem:[%s2177_s30 + $0x54] sm:$0xf] %v254_v21  ;;  %257 = vst [vmem:[%s2177_s30 + $0x58] sm:$0xf] %v256_v22  ;;  %v260_v24 = vld [vmem:[%s2175_s29 + $0x68] sm:$0xf] }
  0x21   : >> { %259 = vst [vmem:[%s2177_s30 + $0x5c] sm:$0xf] %v258_v23  ;;  %v262_v25 = vld [vmem:[%s2175_s29 + $0x6c] sm:$0xf]  ;;  %v264_v26 = vld [vmem:[%s2175_s29 + $0x70] sm:$0xf] }
  0x22   : >> { %261 = vst [vmem:[%s2177_s30 + $0x60] sm:$0xf] %v260_v24  ;;  %263 = vst [vmem:[%s2177_s30 + $0x64] sm:$0xf] %v262_v25  ;;  %v266_v27 = vld [vmem:[%s2175_s29 + $0x74] sm:$0xf] }
  0x23   : >> { %265 = vst [vmem:[%s2177_s30 + $0x68] sm:$0xf] %v264_v26  ;;  %v268_v28 = vld [vmem:[%s2175_s29 + $0x78] sm:$0xf]  ;;  %v270_v29 = vld [vmem:[%s2175_s29 + $0x7c] sm:$0xf] }
  0x24   : >> { %267 = vst [vmem:[%s2177_s30 + $0x6c] sm:$0xf] %v266_v27  ;;  %269 = vst [vmem:[%s2177_s30 + $0x70] sm:$0xf] %v268_v28  ;;  %v272_v30 = vld [vmem:[%s2175_s29 + $0x80] sm:$0xf] }
  0x25   : >> { %271 = vst [vmem:[%s2177_s30 + $0x74] sm:$0xf] %v270_v29  ;;  %v274_v31 = vld [vmem:[%s2175_s29 + $0x84] sm:$0xf]  ;;  %v276_v32 = vld [vmem:[%s2175_s29 + $0x90] sm:$0xf] }
  0x26   : >> { %273 = vst [vmem:[%s2177_s30 + $0x78] sm:$0xf] %v272_v30  ;;  %275 = vst [vmem:[%s2177_s30 + $0x7c] sm:$0xf] %v274_v31  ;;  %v278_v33 = vld [vmem:[%s2175_s29 + $0x94] sm:$0xf] }
  0x27   : >> { %277 = vst [vmem:[%s2177_s30 + $0x80] sm:$0xf] %v276_v32  ;;  %v280_v34 = vld [vmem:[%s2175_s29 + $0x98] sm:$0xf]  ;;  %v282_v35 = vld [vmem:[%s2175_s29 + $0x9c] sm:$0xf] }
  0x28   : >> { %279 = vst [vmem:[%s2177_s30 + $0x84] sm:$0xf] %v278_v33  ;;  %281 = vst [vmem:[%s2177_s30 + $0x88] sm:$0xf] %v280_v34  ;;  %v284_v36 = vld [vmem:[%s2175_s29 + $0xa0] sm:$0xf] }
  0x29   : >> { %283 = vst [vmem:[%s2177_s30 + $0x8c] sm:$0xf] %v282_v35  ;;  %v286_v37 = vld [vmem:[%s2175_s29 + $0xa4] sm:$0xf]  ;;  %v288_v38 = vld [vmem:[%s2175_s29 + $0xa8] sm:$0xf] }
  0x2a   : >> { %285 = vst [vmem:[%s2177_s30 + $0x90] sm:$0xf] %v284_v36  ;;  %287 = vst [vmem:[%s2177_s30 + $0x94] sm:$0xf] %v286_v37  ;;  %v290_v39 = vld [vmem:[%s2175_s29 + $0xac] sm:$0xf] }
  0x2b   : >> { %289 = vst [vmem:[%s2177_s30 + $0x98] sm:$0xf] %v288_v38  ;;  %v292_v40 = vld [vmem:[%s2175_s29 + $0xb0] sm:$0xf]  ;;  %v294_v41 = vld [vmem:[%s2175_s29 + $0xb4] sm:$0xf] }
  0x2c   : >> { %291 = vst [vmem:[%s2177_s30 + $0x9c] sm:$0xf] %v290_v39  ;;  %293 = vst [vmem:[%s2177_s30 + $0xa0] sm:$0xf] %v292_v40  ;;  %v296_v42 = vld [vmem:[%s2175_s29 + $0xb8] sm:$0xf] }
  0x2d   : >> { %295 = vst [vmem:[%s2177_s30 + $0xa4] sm:$0xf] %v294_v41  ;;  %v298_v43 = vld [vmem:[%s2175_s29 + $0xbc] sm:$0xf]  ;;  %v300_v44 = vld [vmem:[%s2175_s29 + $0xc0] sm:$0xf] }
  0x2e   : >> { %297 = vst [vmem:[%s2177_s30 + $0xa8] sm:$0xf] %v296_v42  ;;  %299 = vst [vmem:[%s2177_s30 + $0xac] sm:$0xf] %v298_v43  ;;  %v302_v45 = vld [vmem:[%s2175_s29 + $0xc4] sm:$0xf] }
  0x2f   : >> { %301 = vst [vmem:[%s2177_s30 + $0xb0] sm:$0xf] %v300_v44  ;;  %v304_v46 = vld [vmem:[%s2175_s29 + $0xc8] sm:$0xf]  ;;  %v306_v47 = vld [vmem:[%s2175_s29 + $0xcc] sm:$0xf] }
  0x30   : >> { %303 = vst [vmem:[%s2177_s30 + $0xb4] sm:$0xf] %v302_v45  ;;  %305 = vst [vmem:[%s2177_s30 + $0xb8] sm:$0xf] %v304_v46  ;;  %v308_v48 = vld [vmem:[%s2175_s29 + $0xd8] sm:$0xf] }
  0x31   : >> { %307 = vst [vmem:[%s2177_s30 + $0xbc] sm:$0xf] %v306_v47  ;;  %v310_v49 = vld [vmem:[%s2175_s29 + $0xdc] sm:$0xf]  ;;  %v312_v50 = vld [vmem:[%s2175_s29 + $0xe0] sm:$0xf] }
  0x32   : >> { %309 = vst [vmem:[%s2177_s30 + $0xc0] sm:$0xf] %v308_v48  ;;  %311 = vst [vmem:[%s2177_s30 + $0xc4] sm:$0xf] %v310_v49  ;;  %v314_v51 = vld [vmem:[%s2175_s29 + $0xe4] sm:$0xf] }
  0x33   : >> { %313 = vst [vmem:[%s2177_s30 + $0xc8] sm:$0xf] %v312_v50  ;;  %v316_v52 = vld [vmem:[%s2175_s29 + $0xe8] sm:$0xf]  ;;  %v318_v53 = vld [vmem:[%s2175_s29 + $0xec] sm:$0xf] }
  0x34   : >> { %315 = vst [vmem:[%s2177_s30 + $0xcc] sm:$0xf] %v314_v51  ;;  %317 = vst [vmem:[%s2177_s30 + $0xd0] sm:$0xf] %v316_v52  ;;  %v320_v54 = vld [vmem:[%s2175_s29 + $0xf0] sm:$0xf] }
  0x35   : >> { %319 = vst [vmem:[%s2177_s30 + $0xd4] sm:$0xf] %v318_v53  ;;  %v322_v55 = vld [vmem:[%s2175_s29 + $0xf4] sm:$0xf]  ;;  %v324_v56 = vld [vmem:[%s2175_s29 + $0xf8] sm:$0xf] }
  0x36   : >> { %321 = vst [vmem:[%s2177_s30 + $0xd8] sm:$0xf] %v320_v54  ;;  %323 = vst [vmem:[%s2177_s30 + $0xdc] sm:$0xf] %v322_v55  ;;  %v326_v57 = vld [vmem:[%s2175_s29 + $0xfc] sm:$0xf] }
  0x37   : >> { %325 = vst [vmem:[%s2177_s30 + $0xe0] sm:$0xf] %v324_v56  ;;  %v328_v58 = vld [vmem:[%s2175_s29 + $0x100] sm:$0xf]  ;;  %v330_v59 = vld [vmem:[%s2175_s29 + $0x104] sm:$0xf] }
  0x38   : >> { %327 = vst [vmem:[%s2177_s30 + $0xe4] sm:$0xf] %v326_v57  ;;  %329 = vst [vmem:[%s2177_s30 + $0xe8] sm:$0xf] %v328_v58  ;;  %v332_v60 = vld [vmem:[%s2175_s29 + $0x108] sm:$0xf] }
  0x39   : >> { %331 = vst [vmem:[%s2177_s30 + $0xec] sm:$0xf] %v330_v59  ;;  %v334_v61 = vld [vmem:[%s2175_s29 + $0x10c] sm:$0xf]  ;;  %v336_v62 = vld [vmem:[%s2175_s29 + $0x110] sm:$0xf] }
  0x3a   : >> { %333 = vst [vmem:[%s2177_s30 + $0xf0] sm:$0xf] %v332_v60  ;;  %335 = vst [vmem:[%s2177_s30 + $0xf4] sm:$0xf] %v334_v61  ;;  %v338_v63 = vld [vmem:[%s2175_s29 + $0x114] sm:$0xf] }
  0x3b   : >> { %337 = vst [vmem:[%s2177_s30 + $0xf8] sm:$0xf] %v336_v62  ;;  %339 = vst [vmem:[%s2177_s30 + $0xfc] sm:$0xf] %v338_v63  ;;  %p205_p6 = scmp.ge.s32.totalorder %s206_s5, 1 }
  0x3d   : > { %208 = sbr.rel (!%p205_p6) target bundleno = 17 (0x11), region = 182 }
  0x42 PF: > { %p1810_p7 = scmp.ge.s32.totalorder %s2093_s19, 1  ;;  %p612_p8 = scmp.lt.s32.totalorder %s2093_s19, 3 }
  0x44   : > { %p613_p9 = pnand %p1810_p7, %p612_p8 }
  0x45   : > { %s619_s6 = sand.u32 (!%p613_p9), 1, %s2077_s15   ;;  %s2099_s9 = smov (!%p613_p9), 4  }
  0x46   : > { %616 = sbr.rel (%p613_p9) target bundleno = 530 (0x212), region = 94  ;;  %s1811_s7 = sshll.u32 (!%p613_p9), %s619_s6, 8 }
  0x47   : > { %s2318_s8 = scalar_lea.vmem (!%p613_p9), [#allocation3], %s1811_s7  ;;  %s2100_s10 = smov (!%p613_p9), 8  }
  0x48   : > { %s2101_s11 = smov (!%p613_p9), 12   ;;  %s2102_s12 = smov (!%p613_p9), 16  }
  0x49   : > { %s2103_s13 = smov (!%p613_p9), 20   ;;  %p663_p10 = scmp.lt.s32.totalorder (!%p613_p9), %s2085_s17, 1 }
  0x4a   : > { %s2104_s14 = smov (!%p613_p9), 24   ;;  %s2105_s25 = smov (!%p613_p9), 28  }
  0x4b   : > { %v1827_v0 = vld [vmem:[%s2318_s8 + $0x60] sm:$0xf]  ;;  %vm766_vm0 = vsmask.f32 3328  ;;  %v1828_v2 = vld [vmem:[%s2318_s8 + $0x68] sm:$0xf] }
  0x4c   : > { %v1823_v1 = vld [vmem:[%s2318_s8 + $0x40] sm:$0xf]  ;;  %739 = vrot.lane.b32.xlu1 %v1827_v0, %s2099_s9  ;;  %v1824_v3 = vld [vmem:[%s2318_s8 + $0x48] sm:$0xf]  ;;  %vm767_vm1 = vsmask.f32 7440 }
  0x4d   : > { %710 = vrot.lane.b32.xlu0 %v1823_v1, %s2099_s9  ;;  %v1831_v4 = vld [vmem:[%s2318_s8 + $0x8] sm:$0xf]  ;;  %v1832_v5 = vld [vmem:[%s2318_s8 + $0xc] sm:$0x1]  ;;  %v764_v6 = vld [vmem:[%s2318_s8] sm:$0xf] }
  0x4e   : > { %v1826_v7 = vld [vmem:[%s2318_s8 + $0x58] sm:$0xf]  ;;  %v1825_v8 = vld [vmem:[%s2318_s8 + $0x50] sm:$0xf]  ;;  %v791_v9 = vshrl.u32 %v1831_v4, 16  ;;  %v794_v10 = vshll.u32 %v1831_v4, 16  ;;  %vm2345_vm2 = vmor %vm766_vm0, %vm767_vm1 }
  0x4f   : > { %v800_v11 = vshll.u32 %v1832_v5, 16  ;;  %v765_v12 = vld [vmem:[%s2318_s8 + $0x4] sm:$0x1]  ;;  %v770_v13 = vshrl.u32 %v764_v6, 16  ;;  %v773_v14 = vshll.u32 %v764_v6, 16  ;;  %vm684_vm3 = vcmask 27648  }
  0x50   : > { %746 = vrot.lane.b32.xlu1 %v1828_v2, %s2099_s9  ;;  %v779_v15 = vshll.u32 %v765_v12, 16  ;;  %v1839_v16 = vld [vmem:[%s2318_s8 + $0x28] sm:$0xf]  ;;  %v1840_v17 = vld [vmem:[%s2318_s8 + $0x2c] sm:$0x1]  ;;  %v793_v18 = vrot.slane %v791_v9, 4 }
  0x51   : > { %718 = vrot.lane.b32.xlu0 %v1824_v3, %s2099_s9  ;;  %v796_v19 = vrot.slane %v794_v10, 5  ;;  %v802_v20 = vrot.slane %v800_v11, 5  ;;  %v772_v21 = vrot.slane %v770_v13, 4  ;;  %v1837_v22 = vld [vmem:[%s2318_s8 + $0x20] sm:$0xf]  ;;  %v775_v23 = vrot.slane %v773_v14, 5 }
  0x52   : > { %v781_v24 = vrot.slane %v779_v15, 5  ;;  %v871_v25 = vshrl.u32 %v1839_v16, 16  ;;  %v874_v26 = vshll.u32 %v1839_v16, 16  ;;  %v1838_v27 = vld [vmem:[%s2318_s8 + $0x24] sm:$0x1]  ;;  %v880_v31 = vshll.u32 %v1840_v17, 16 }
  0x53   : > { %v1830_v28 = vld [vmem:[%s2318_s8 + $0x78] sm:$0xf]  ;;  %v1829_v29 = vld [vmem:[%s2318_s8 + $0x70] sm:$0xf]  ;;  %v797_v30 = vor.u32 %v796_v19, %v793_v18  ;;  %v851_v32 = vshrl.u32 %v1837_v22, 16  ;;  %v854_v33 = vshll.u32 %v1837_v22, 16  ;;  %v776_v36 = vor.u32 %v775_v23, %v772_v21 }
  0x54   : > { %v1835_v34 = vld [vmem:[%s2318_s8 + $0x18] sm:$0xf]  ;;  %732 = vrot.lane.b32.xlu1 %v1826_v7, %s2099_s9  ;;  %v873_v37 = vrot.slane %v871_v25, 4  ;;  %v876_v38 = vrot.slane %v874_v26, 5  ;;  %v860_v39 = vshll.u32 %v1838_v27, 16  ;;  %v882_v42 = vrot.slane %v880_v31, 5 }
  0x55   : > { %725 = vrot.lane.b32.xlu0 %v1825_v8, %s2099_s9  ;;  %v1836_v40 = vld [vmem:[%s2318_s8 + $0x1c] sm:$0x1]  ;;  %v798_v41 = vrot.slane %v797_v30, 4  ;;  %v853_v43 = vrot.slane %v851_v32, 4  ;;  %v856_v44 = vrot.slane %v854_v33, 5  ;;  %v777_v46 = vrot.slane %v776_v36, 4 }
  0x56   : > { %v1833_v45 = vld [vmem:[%s2318_s8 + $0x10] sm:$0xf]  ;;  %v877_v47 = vor.u32 %v876_v38, %v873_v37  ;;  %v862_v48 = vrot.slane %v860_v39, 5  ;;  %v831_v49 = vshrl.u32 %v1835_v34, 16  ;;  %v834_v52 = vshll.u32 %v1835_v34, 16  ;;  %s2801_s17 = smov (!%p663_p10, %s2085_s17), 1 }
  0x57   : > { %v803_v50 = vsel %vm2345_vm2, %v798_v41, %v802_v20  ;;  %v857_v51 = vor.u32 %v856_v44, %v853_v43  ;;  %v840_v53 = vshll.u32 %v1836_v40, 16  ;;  %v1834_v54 = vld [vmem:[%s2318_s8 + $0x14] sm:$0x1]  ;;  %v1843_v55 = vld [vmem:[%s2318_s8 + $0x38] sm:$0xf]  ;;  %v782_v56 = vsel %vm2345_vm2, %v777_v46, %v781_v24  ;;  %s1920_s15 = sshll.u32 %s2801_s17, 4 }
  0x58   : > { %760 = vrot.lane.b32.xlu1 %v1830_v28, %s2099_s9  ;;  %v878_v57 = vrot.slane %v877_v47, 4  ;;  %v833_v58 = vrot.slane %v831_v49, 4  ;;  %v811_v59 = vshrl.u32 %v1833_v45, 16  ;;  %v1844_v60 = vld [vmem:[%s2318_s8 + $0x3c] sm:$0x1]  ;;  %v836_v62 = vrot.slane %v834_v52, 5  ;;  %s2619_s24 = scalar_lea.vmem %s2788_s1, %s1920_s15 }
  0x59   : > { %753 = vrot.lane.b32.xlu0 %v1829_v29, %s2099_s9  ;;  %v858_v61 = vrot.slane %v857_v51, 4  ;;  %v842_v63 = vrot.slane %v840_v53, 5  ;;  %v814_v0 = vshll.u32 %v1833_v45, 16  ;;  %v1841_v1 = vld [vmem:[%s2318_s8 + $0x30] sm:$0xf]  ;;  %v820_v4 = vshll.u32 %v1834_v54, 16 }
  0x5a   : > { %v883_v2 = vsel %vm2345_vm2, %v878_v57, %v882_v42  ;;  %v813_v3 = vrot.slane %v811_v59, 4  ;;  %v911_v5 = vshrl.u32 %v1843_v55, 16  ;;  %v837_v7 = vor.u32 %v836_v62, %v833_v58  ;;  %v1842_v10 = vld [vmem:[%s2318_s8 + $0x34] sm:$0x1]  ;;  %v1863_v33 = vld [vmem:[%s2318_s8 + $0x88] sm:$0xf] }
  0x5b   : > { %v863_v6 = vsel %vm2345_vm2, %v858_v61, %v862_v48  ;;  %v816_v8 = vrot.slane %v814_v0, 5  ;;  %v914_v9 = vshll.u32 %v1843_v55, 16  ;;  %v822_v11 = vrot.slane %v820_v4, 5  ;;  %v1861_v34 = vld [vmem:[%s2318_s8 + $0x80] sm:$0xf]  ;;  %s2106_s6 = smov 32  }
  0x5c   : > { %804 = vrot.lane.b32.xlu1 %v803_v50, %s2100_s10  ;;  %v913_v12 = vrot.slane %v911_v5, 4  ;;  %v920_v13 = vshll.u32 %v1844_v60, 16  ;;  %v891_v14 = vshrl.u32 %v1841_v1, 16  ;;  %v838_v15 = vrot.slane %v837_v7, 4  ;;  %v1846_v36 = vld [vmem:[%s2318_s8 + $0x88] sm:$0xf] }
  0x5d   : > { %783 = vrot.lane.b32.xlu0 %v782_v56, %s2100_s10  ;;  %v817_v16 = vor.u32 %v816_v8, %v813_v3  ;;  %v916_v17 = vrot.slane %v914_v9, 5  ;;  %v894_v18 = vshll.u32 %v1841_v1, 16  ;;  %v900_v20 = vshll.u32 %v1842_v10, 16  ;;  %v1845_v37 = vld [vmem:[%s2318_s8 + $0x80] sm:$0xf]  ;;  %s1921_s9 = sshll.u32 %s2801_s17, 6 }
  0x5e   : > { %v893_v19 = vrot.slane %v891_v14, 4  ;;  %v843_v24 = vsel %vm2345_vm2, %v838_v15, %v842_v63  ;;  %v922_v25 = vrot.slane %v920_v13, 5  ;;  %v1871_v38 = vld [vmem:[%s2318_s8 + $0xa8] sm:$0xf]  ;;  %v1869_v39 = vld [vmem:[%s2318_s8 + $0xa0] sm:$0xf] }
  0x5f   : > { %v818_v21 = vrot.slane %v817_v16, 4  ;;  %v917_v22 = vor.u32 %v916_v17, %v913_v12  ;;  %v896_v23 = vrot.slane %v894_v18, 5  ;;  %v902_v29 = vrot.slane %v900_v20, 5  ;;  %v1864_v44 = vld [vmem:[%s2318_s8 + $0x8c] sm:$0x1] }
  0x60   : > { %884 = vrot.lane.b32.xlu1 %v883_v2, %s2100_s10  ;;  %v1066_v40 = vshrl.u32 %v1863_v33, 16  ;;  %v1069_v41 = vshll.u32 %v1863_v33, 16  ;;  %v1045_v42 = vshrl.u32 %v1861_v34, 16  ;;  %v1048_v43 = vshll.u32 %v1861_v34, 16  ;;  %v1850_v49 = vld [vmem:[%s2318_s8 + $0xa8] sm:$0xf] }
  0x61   : > { %864 = vrot.lane.b32.xlu0 %v863_v6, %s2100_s10  ;;  %v823_v26 = vsel %vm2345_vm2, %v818_v21, %v822_v11  ;;  %v918_v27 = vrot.slane %v917_v22, 4  ;;  %v897_v28 = vor.u32 %v896_v23, %v893_v19  ;;  %v1146_v45 = vshrl.u32 %v1871_v38, 16  ;;  %v1849_v50 = vld [vmem:[%s2318_s8 + $0xa0] sm:$0xf]  ;;  %v1862_v53 = vld [vmem:[%s2318_s8 + $0x84] sm:$0x1] }
  0x62   : > { %v1149_v46 = vshll.u32 %v1871_v38, 16  ;;  %v1126_v47 = vshrl.u32 %v1869_v39, 16  ;;  %v1129_v48 = vshll.u32 %v1869_v39, 16  ;;  %v1068_v51 = vrot.slane %v1066_v40, 4  ;;  %v1848_v56 = vld [vmem:[%s2318_s8 + $0x98] sm:$0xf] }
  0x63   : > { %v898_v30 = vrot.slane %v897_v28, 4  ;;  %v923_v31 = vsel %vm2345_vm2, %v918_v27, %v922_v25  ;;  %v1071_v52 = vrot.slane %v1069_v41, 5  ;;  %v1047_v54 = vrot.slane %v1045_v42, 4  ;;  %v1847_v57 = vld [vmem:[%s2318_s8 + $0x90] sm:$0xf] }
  0x64   : > { %844 = vrot.lane.b32.xlu1 %v843_v24, %s2100_s10  ;;  %v1050_v55 = vrot.slane %v1048_v43, 5  ;;  %v1075_v58 = vshll.u32 %v1864_v44, 16  ;;  %v1867_v59 = vld [vmem:[%s2318_s8 + $0x98] sm:$0xf]  ;;  %v1872_v60 = vld [vmem:[%s2318_s8 + $0xac] sm:$0x1] }
  0x65   : > { %824 = vrot.lane.b32.xlu0 %v823_v26, %s2100_s10  ;;  %v903_v32 = vsel %vm2345_vm2, %v898_v30, %v902_v29  ;;  %v1148_v61 = vrot.slane %v1146_v45, 4  ;;  %v1151_v62 = vrot.slane %v1149_v46, 5  ;;  %v1128_v63 = vrot.slane %v1126_v47, 4  ;;  %v1870_v2 = vld [vmem:[%s2318_s8 + $0xa4] sm:$0x1] }
  0x66   : > { %v1131_v0 = vrot.slane %v1129_v48, 5  ;;  %v1054_v1 = vshll.u32 %v1862_v53, 16  ;;  %v1868_v3 = vld [vmem:[%s2318_s8 + $0x9c] sm:$0x1]  ;;  %v1072_v4 = vor.u32 %v1071_v52, %v1068_v51  ;;  %v1051_v5 = vor.u32 %v1050_v55, %v1047_v54  ;;  %v1865_v8 = vld [vmem:[%s2318_s8 + $0x90] sm:$0xf] }
  0x67   : > { %v1106_v6 = vshrl.u32 %v1867_v59, 16  ;;  %v1109_v7 = vshll.u32 %v1867_v59, 16  ;;  %v1866_v9 = vld [vmem:[%s2318_s8 + $0x94] sm:$0x1]  ;;  %v2404_v10 = vrot.slane %v1075_v58, 5  ;;  %v1155_v11 = vshll.u32 %v1872_v60, 16 }
  0x68   : > { %924 = vrot.lane.b32.xlu1 %v923_v31, %s2100_s10  ;;  %v1852_v12 = vld [vmem:[%s2318_s8 + $0xb8] sm:$0xf]  ;;  %v1152_v13 = vor.u32 %v1151_v62, %v1148_v61  ;;  %v1132_v14 = vor.u32 %v1131_v0, %v1128_v63  ;;  %v1135_v15 = vshll.u32 %v1870_v2, 16  ;;  %v1115_v16 = vshll.u32 %v1868_v3, 16  ;;  %v1851_v18 = vld [vmem:[%s2318_s8 + $0xb0] sm:$0xf] }
  0x69   : > { %904 = vrot.lane.b32.xlu0 %v903_v32, %s2100_s10  ;;  %v1875_v17 = vld [vmem:[%s2318_s8 + $0xb8] sm:$0xf]  ;;  %v2411_v19 = vrot.slane %v1054_v1, 5  ;;  %v1086_v20 = vshrl.u32 %v1865_v8, 16  ;;  %v1089_v21 = vshll.u32 %v1865_v8, 16  ;;  %v1095_v22 = vshll.u32 %v1866_v9, 16 }
  0x6a   : > { %v2413_v23 = vrot.slane %v1072_v4, 4  ;;  %v2415_v24 = vrot.slane %v1051_v5, 4  ;;  %v2417_v25 = vrot.slane %v1106_v6, 4  ;;  %v2419_v26 = vrot.slane %v1109_v7, 5  ;;  %v1854_v27 = vld [vmem:[%s2318_s8 + $0xc8] sm:$0xf] }
  0x6b   : > { %v2422_v28 = vrot.slane %v1155_v11, 5  ;;  %v1186_v29 = vshrl.u32 %v1875_v17, 16  ;;  %v1853_v30 = vld [vmem:[%s2318_s8 + $0xc0] sm:$0xf]  ;;  %v2427_v31 = vrot.slane %v1152_v13, 4  ;;  %v2429_v32 = vrot.slane %v1132_v14, 4 }
  0x6c   : > { %939 = vrot.lane.b32.xlu1 %v1846_v36, %s2101_s11  ;;  %v2431_v33 = vrot.slane %v1135_v15, 5  ;;  %v2433_v34 = vrot.slane %v1115_v16, 5  ;;  %v2435_v36 = vrot.slane %v1086_v20, 4  ;;  %v2439_v38 = vrot.slane %v1095_v22, 5  ;;  %v2442_v40 = vld [vmem:[%s2318_s8 + $0xb0] sm:$0xf] }
  0x6d   : > { %931 = vrot.lane.b32.xlu0 %v1845_v37, %s2101_s11  ;;  %v2437_v37 = vrot.slane %v1089_v21, 5  ;;  %v1189_v39 = vshll.u32 %v1875_v17, 16  ;;  %v1078_v41 = vsel %vm2345_vm2, %v2413_v23, %v2404_v10  ;;  %v1057_v42 = vsel %vm2345_vm2, %v2415_v24, %v2411_v19  ;;  %v1894_v44 = vld [vmem:[%s2318_s8 + $0x10] sm:$0xf]  ;;  %v1895_v45 = vld [vmem:[%s2318_s8 + $0x14] sm:$0x1] }
  0x6e   : > { %v1112_v43 = vor.u32 %v2419_v26, %v2417_v25  ;;  %v1892_v46 = vld [vmem:[%s2318_s8 + $0x8] sm:$0xf]  ;;  %v1857_v48 = vld [vmem:[%s2318_s8 + $0xe0] sm:$0xf]  ;;  %v1329_v51 = vshll.u32 %v1894_v44, 16  ;;  %v1335_v52 = vshll.u32 %v1895_v45, 16 }
  0x6f   : > { %v1858_v47 = vld [vmem:[%s2318_s8 + $0xe8] sm:$0xf]  ;;  %v1893_v53 = vld [vmem:[%s2318_s8 + $0xc] sm:$0x1]  ;;  %v1166_v54 = vshrl.u32 %v2442_v40, 16  ;;  %v1305_v55 = vshrl.u32 %v1892_v46, 16  ;;  %v1092_v7 = vor.u32 %v2437_v37, %v2435_v36 }
  0x70   : > { %967 = vrot.lane.b32.xlu1 %v1850_v49, %s2101_s11  ;;  %v2459_v49 = vrot.slane %v1186_v29, 4  ;;  %v1819_v58 = vld [vmem:[%s2318_s8 + $0x20] sm:$0xf]  ;;  %v2466_v59 = vrot.slane %v1189_v39, 5  ;;  %v1169_v60 = vshll.u32 %v2442_v40, 16  ;;  %v1331_v62 = vrot.slane %v1329_v51, 5 }
  0x71   : > { %960 = vrot.lane.b32.xlu0 %v1849_v50, %s2101_s11  ;;  %v1326_v50 = vshrl.u32 %v1894_v44, 16  ;;  %697 = vst.msk [vmem:[#allocation2 + $0x10] sm:$0xf] %vm684_vm3, %v1819_v58  ;;  %v683_v63 = vld [vmem:[%s2318_s8] sm:$0xf]  ;;  %v2471_v0 = vrot.slane %v1335_v52, 5 }
  0x72   : > { %v1307_v1 = vrot.slane %v1305_v55, 4  ;;  %685 = vst.msk [vmem:[#allocation2] sm:$0xf] %vm684_vm3, %v683_v63  ;;  %v1902_v4 = vld [vmem:[%s2318_s8 + $0x30] sm:$0xf]  ;;  %v1093_v25 = vrot.slane %v1092_v7, 4  ;;  %v1192_v26 = vor.u32 %v2466_v59, %v2459_v49 }
  0x73   : > { %v1328_v61 = vrot.slane %v1326_v50, 4  ;;  %v1856_v5 = vld [vmem:[%s2318_s8 + $0xd8] sm:$0xf]  ;;  %v1855_v6 = vld [vmem:[%s2318_s8 + $0xd0] sm:$0xf]  ;;  %v1406_v11 = vshrl.u32 %v1902_v4, 16 }
  0x74   : > { %953 = vrot.lane.b32.xlu1 %v1848_v56, %s2101_s11  ;;  %v1308_v56 = vshll.u32 %v1892_v46, 16  ;;  %v1903_v9 = vld [vmem:[%s2318_s8 + $0x34] sm:$0x1]  ;;  %v1900_v13 = vld [vmem:[%s2318_s8 + $0x28] sm:$0xf]  ;;  %vm1531_vm4 = vcmask 1041408  }
  0x75   : > { %946 = vrot.lane.b32.xlu0 %v1847_v57, %s2101_s11  ;;  %v1314_v57 = vshll.u32 %v1893_v53, 16  ;;  %v1332_v8 = vor.u32 %v1331_v62, %v1328_v61  ;;  %v1415_v15 = vshll.u32 %v1903_v9, 16  ;;  %v1901_v16 = vld [vmem:[%s2318_s8 + $0x2c] sm:$0x1]  ;;  %v1386_v17 = vshrl.u32 %v1900_v13, 16 }
  0x76   : > { %v1310_v2 = vrot.slane %v1308_v56, 5  ;;  %v1408_v21 = vrot.slane %v1406_v11, 4  ;;  %v1820_v29 = vld [vmem:[%s2318_s8 + $0x28] sm:$0xf]  ;;  %v1899_v55 = vld [vmem:[%s2318_s8 + $0x24] sm:$0x1] }
  0x77   : > { %v2473_v3 = vrot.slane %v1314_v57, 5  ;;  %v2486_v20 = vrot.slane %v1332_v8, 4  ;;  %v1388_v44 = vrot.slane %v1386_v17, 4  ;;  %700 = vst.msk [vmem:[#allocation2 + $0x14] sm:$0xf] %vm684_vm3, %v1820_v29  ;;  %v2501_v52 = vrot.slane %v1415_v15, 5 }
  0x78   : > { %981 = vrot.lane.b32.xlu1 %v1852_v12, %s2101_s11  ;;  %v1409_v12 = vshll.u32 %v1902_v4, 16  ;;  %v1311_v14 = vor.u32 %v1310_v2, %v1307_v1  ;;  %v1816_v46 = vld [vmem:[%s2318_s8 + $0x8] sm:$0xf]  ;;  %v1896_v62 = vld [vmem:[%s2318_s8 + $0x18] sm:$0xf]  ;;  %v1375_v2 = vshll.u32 %v1899_v55, 16  ;;  %v1138_v55 = vsel %vm2345_vm2, %v2429_v32, %v2431_v33 }
  0x79   : > { %974 = vrot.lane.b32.xlu0 %v1851_v18, %s2101_s11  ;;  %v1389_v18 = vshll.u32 %v1900_v13, 16  ;;  %v1338_v50 = vsel %vm2345_vm2, %v2486_v20, %v2471_v0  ;;  %688 = vst.msk [vmem:[#allocation2 + $0x4] sm:$0xf] %vm684_vm3, %v1816_v46  ;;  %v1897_v63 = vld [vmem:[%s2318_s8 + $0x1c] sm:$0x1]  ;;  %v1346_v4 = vshrl.u32 %v1896_v62, 16 }
  0x7a   : > { %v1411_v22 = vrot.slane %v1409_v12, 5  ;;  %v2491_v39 = vrot.slane %v1311_v14, 4  ;;  %v1349_v8 = vshll.u32 %v1896_v62, 16  ;;  %v1876_v9 = vld [vmem:[%s2318_s8 + $0xbc] sm:$0x1]  ;;  %v1355_v13 = vshll.u32 %v1897_v63, 16 }
  0x7b   : > { %v1391_v45 = vrot.slane %v1389_v18, 5  ;;  %v1817_v14 = vld [vmem:[%s2318_s8 + $0x10] sm:$0xf]  ;;  %v1874_v15 = vld [vmem:[%s2318_s8 + $0xb4] sm:$0x1]  ;;  %v1348_v18 = vrot.slane %v1346_v4, 4 }
  0x7c   : > { %996 = vrot.lane.b32.xlu1 %v1854_v27, %s2102_s12  ;;  %v1395_v27 = vshll.u32 %v1901_v16, 16  ;;  %v1412_v51 = vor.u32 %v1411_v22, %v1408_v21  ;;  %v1317_v56 = vsel %vm2345_vm2, %v2491_v39, %v2473_v3  ;;  %v1171_v16 = vrot.slane %v1169_v60, 5  ;;  %691 = vst.msk [vmem:[#allocation2 + $0x8] sm:$0xf] %vm684_vm3, %v1817_v14  ;;  %v1904_v29 = vld [vmem:[%s2318_s8 + $0x38] sm:$0xf] }
  0x7d   : > { %988 = vrot.lane.b32.xlu0 %v1853_v30, %s2102_s12  ;;  %v2489_v30 = vrot.slane %v1166_v54, 4  ;;  %v1898_v54 = vld [vmem:[%s2318_s8 + $0x20] sm:$0xf]  ;;  %v1392_v57 = vor.u32 %v1391_v45, %v1388_v44  ;;  %v1351_v21 = vrot.slane %v1349_v8, 5  ;;  %v2538_v22 = vrot.slane %v1375_v2, 5 }
  0x7e   : > { %v2503_v53 = vrot.slane %v1395_v27, 5  ;;  %v1366_v58 = vshrl.u32 %v1898_v54, 16  ;;  %v1369_v61 = vshll.u32 %v1898_v54, 16  ;;  %v2516_v1 = vrot.slane %v1412_v51, 4  ;;  %v1905_v44 = vld [vmem:[%s2318_s8 + $0x3c] sm:$0x1] }
  0x7f   : > { %v2540_v27 = vrot.slane %v1355_v13, 5  ;;  %v1352_v45 = vor.u32 %v1351_v21, %v1348_v18  ;;  %v1426_v46 = vshrl.u32 %v1904_v29, 16  ;;  %v1429_v51 = vshll.u32 %v1904_v29, 16  ;;  %v1877_v7 = vld [vmem:[%s2318_s8 + $0x8] sm:$0xf] }
  0x80   : > { %1024 = vrot.lane.b32.xlu1 %v1858_v47, %s2102_s12  ;;  %v1860_v47 = vld [vmem:[%s2318_s8 + $0xf8] sm:$0xf]  ;;  %v1368_v11 = vrot.slane %v1366_v58, 4  ;;  %v1371_v12 = vrot.slane %v1369_v61, 5  ;;  %v1418_v17 = vsel %vm2345_vm2, %v2516_v1, %v2501_v52  ;;  %v1435_v54 = vshll.u32 %v1905_v44, 16 }
  0x81   : > { %1017 = vrot.lane.b32.xlu0 %v1857_v48, %s2102_s12  ;;  %v1859_v48 = vld [vmem:[%s2318_s8 + $0xf0] sm:$0xf]  ;;  %v1195_v62 = vshll.u32 %v1876_v9, 16  ;;  %v2560_v63 = vrot.slane %v1352_v45, 4  ;;  %v1428_v2 = vrot.slane %v1426_v46, 4  ;;  %v1431_v4 = vrot.slane %v1429_v51, 5 }
  0x82   : > { %v1372_v60 = vor.u32 %v1371_v12, %v1368_v11  ;;  %v1821_v61 = vld [vmem:[%s2318_s8 + $0x30] sm:$0xf]  ;;  %v1172_v23 = vor.u32 %v1171_v16, %v2489_v30  ;;  %v1881_v8 = vld [vmem:[%s2318_s8 + $0x28] sm:$0xf]  ;;  %v1879_v9 = vld [vmem:[%s2318_s8 + $0x18] sm:$0xf] }
  0x83   : > { %703 = vst.msk [vmem:[#allocation2 + $0x18] sm:$0xf] %vm684_vm3, %v1821_v61  ;;  %v1358_v19 = vsel %vm2345_vm2, %v2560_v63, %v2540_v27  ;;  %v1432_v24 = vor.u32 %v1431_v4, %v1428_v2  ;;  %v1197_v36 = vrot.slane %v1195_v62, 5  ;;  %v1882_v30 = vld [vmem:[%s2318_s8 + $0x30] sm:$0xf]  ;;  %v2035_v61 = vld [vmem:[%s2789_s2] sm:$0xff]  }
  0x84   : > { %1010 = vrot.lane.b32.xlu1 %v1856_v5, %s2102_s12  ;;  %v1818_v5 = vld [vmem:[%s2318_s8 + $0x18] sm:$0xf]  ;;  %v2556_v58 = vrot.slane %v1372_v60, 4  ;;  %v1246_v11 = vld [vmem:[%s2619_s24] sm:$0xf]  ;;  %vm713_vm5 = vcmask 60448  }
  0x85   : > { %1003 = vrot.lane.b32.xlu0 %v1855_v6, %s2102_s12  ;;  %v2520_v6 = vrot.slane %v1392_v57, 4  ;;  %694 = vst.msk [vmem:[#allocation2 + $0xc] sm:$0xf] %vm684_vm3, %v1818_v5  ;;  %v1113_v57 = vrot.slane %v1112_v43, 4  ;;  %v2589_v32 = vrot.slane %v1432_v24, 4  ;;  %v1173_v43 = vrot.slane %v1172_v23, 4 }
  0x86   : > { %v1378_v10 = vsel %vm2345_vm2, %v2556_v58, %v2538_v22  ;;  %v1880_v5 = vld [vmem:[%s2318_s8 + $0x20] sm:$0xf]  ;;  %v1883_v12 = vld [vmem:[%s2318_s8 + $0x38] sm:$0xf]  ;;  %v1885_v13 = vld [vmem:[%s2318_s8 + $0x50] sm:$0xf] }
  0x87   : > { %v1398_v40 = vsel %vm2345_vm2, %v2520_v6, %v2503_v53  ;;  %v1118_v33 = vsel %vm2345_vm2, %v1113_v57, %v2433_v34  ;;  %v1884_v14 = vld [vmem:[%s2318_s8 + $0x48] sm:$0xf]  ;;  %v1887_v18 = vld [vmem:[%s2318_s8 + $0x60] sm:$0xf]  ;;  %v1886_v21 = vld [vmem:[%s2318_s8 + $0x58] sm:$0xf] }
  0x88   : > { %1038 = vrot.lane.b32.xlu1 %v1860_v47, %s2102_s12  ;;  %v1822_v47 = vld [vmem:[%s2318_s8 + $0x38] sm:$0xf]  ;;  %v1888_v16 = vld [vmem:[%s2318_s8 + $0x68] sm:$0xf]  ;;  %v1443_v60 = vld [vmem:[%s2619_s24] sm:$0xf] }
  0x89   : > { %1031 = vrot.lane.b32.xlu0 %v1859_v48, %s2102_s12  ;;  %v1158_v48 = vsel %vm2345_vm2, %v2427_v31, %v2422_v28  ;;  %706 = vst.msk [vmem:[#allocation2 + $0x1c] sm:$0xf] %vm684_vm3, %v1822_v47  ;;  %v1175_v28 = vshll.u32 %v1874_v15, 16  ;;  %v2587_v31 = vrot.slane %v1435_v54, 5  ;;  %v1889_v15 = vld [vmem:[%s2318_s8 + $0x70] sm:$0xf]  ;;  %s2754_s12 = scalar_lea.vmem %s2791_s4, %s1921_s9 }
  0x8a   : > { %v2032_v29 = vld [vmem:[%s2789_s2 + $0x10] ss:$0 sps:$4 sm:$0x33]   ;;  %v1891_v45 = vld [vmem:[%s2619_s24 + $0x8] sm:$0xf]  ;;  %v1446_v51 = vshrl.u32 %v1443_v60, 16 }
  0x8b   : > { %v1177_v37 = vrot.slane %v1175_v28, 5  ;;  %v1438_v49 = vsel %vm2345_vm2, %v2589_v32, %v2587_v31  ;;  %v1533_v44 = vsel %vm1531_vm4, %v2032_v29, 0  ;;  %v1890_v46 = vld [vmem:[%s2318_s8 + $0x78] sm:$0xf]  ;;  %v1449_v54 = vshll.u32 %v1443_v60, 16  ;;  %1949 = vmatprep.subr.msk.bf16.mxu0 %vm1531_vm4, %v2032_v29  ;;  %1950 = vmatprep.subr.msk.bf16.mxu1 %vm1531_vm4, %v2032_v29  ;;  %v2033_v47 = vld [vmem:[%s2789_s2 + $0x8] sm:$0xff]  }
  0x8c   : > { %1079 = vrot.lane.b32.xlu1 %v1078_v41, %s2103_s13  ;;  %v1098_v41 = vsel %vm2345_vm2, %v1093_v25, %v2439_v38  ;;  %v1878_v38 = vld [vmem:[%s2318_s8 + $0x10] sm:$0xf]  ;;  %1930 = vmatpush3.bf16.msra.mxu0 %v1533_v44  ;;  %v1444_v57 = vld [vmem:[%s2619_s24 + $0x4] sm:$0x1]  ;;  %vm786_vm6 = vcmask 93248   ;;  %vm934_vm7 = vcmask 126048  }
  0x8d   : > { %1058 = vrot.lane.b32.xlu0 %v1057_v42, %s2103_s13  ;;  %v1193_v42 = vrot.slane %v1192_v26, 4  ;;  %v1178_v59 = vsel %vm2345_vm2, %v1173_v43, %v1177_v37  ;;  %1946 = vmatpush3.bf16.msra.mxu1 %v1533_v44  ;;  %v1455_v2 = vshll.u32 %v1444_v57, 16  ;;  %vm991_vm8 = vcmask 158848  }
  0x8e   : > { %1931 = vmatprep.subr.bf16.mxu0 %v2033_v47  ;;  %1944 = vmatprep.subr.bf16.mxu1 %v2033_v47  ;;  %vm1061_vm9 = vcmask 191648   ;;  %vm1208_vm10 = vcmask 224448   ;;  %vm1257_vm11 = vcmask 257248   ;;  %vm1321_vm12 = vcmask 290048  }
  0x8f   : > { %v1198_v34 = vsel %vm2345_vm2, %v1193_v42, %v1197_v36  ;;  %v1457_v3 = vrot.slane %v1455_v2, 5  ;;  %vm1518_vm13 = vcmask 293888   ;;  %vm1616_vm14 = vcmask 64512  }
  0x90   : > { %1159 = vrot.lane.b32.xlu1 %v1158_v48, %s2103_s13  ;;  %v1448_v48 = vrot.slane %v1446_v51, 4  ;;  %1932 = vmatpush3.bf16.msra.mxu0 %v2033_v47 }
  0x91   : > { %1139 = vrot.lane.b32.xlu0 %v1138_v55, %s2103_s13  ;;  %v1451_v55 = vrot.slane %v1449_v54, 5  ;;  %1947 = vmatpush3.bf16.msra.mxu1 %v2033_v47 }
  0x92   : > { %1933 = vmatprep.subr.bf16.mxu0 %v2035_v61  ;;  %1945 = vmatprep.subr.bf16.mxu1 %v2035_v61 }
  0x93   : > { %v1452_v62 = vor.u32 %v1451_v55, %v1448_v48 }
  0x94   : > { %1119 = vrot.lane.b32.xlu1 %v1118_v33, %s2103_s13  ;;  %1934 = vmatpush3.bf16.msra.mxu0 %v2035_v61 }
  0x95   : > { %1099 = vrot.lane.b32.xlu0 %v1098_v41, %s2103_s13  ;;  %1948 = vmatpush3.bf16.msra.mxu1 %v2035_v61  ;;  %v1453_v0 = vrot.slane %v1452_v62, 4 }
  0x98   : > { %1199 = vrot.lane.b32.xlu1 %v1198_v34, %s2103_s13 }
  0x99   : > { %1179 = vrot.lane.b32.xlu0 %v1178_v59, %s2103_s13 }
  0x9c   : > { %1212 = vrot.lane.b32.xlu1 %v1878_v38, %s2104_s14 }
  0x9d   : > { %1205 = vrot.lane.b32.xlu0 %v1877_v7, %s2104_s14 }
  0xa0   : > { %1236 = vrot.lane.b32.xlu1 %v1882_v30, %s2104_s14 }
  0xa1   : > { %1230 = vrot.lane.b32.xlu0 %v1881_v8, %s2104_s14 }
  0xa4   : > { %1224 = vrot.lane.b32.xlu1 %v1880_v5, %s2104_s14 }
  0xa5   : > { %1218 = vrot.lane.b32.xlu0 %v1879_v9, %s2104_s14 }
  0xa8   : > { %1248 = vrot.lane.b32.xlu1 %v1246_v11, %s2104_s14 }
  0xa9   : > { %1242 = vrot.lane.b32.xlu0 %v1883_v12, %s2104_s14 }
  0xac   : > { %1261 = vrot.lane.b32.xlu1 %v1885_v13, %s2105_s25 }
  0xad   : > { %1254 = vrot.lane.b32.xlu0 %v1884_v14, %s2105_s25 }
  0xb0   : > { %1285 = vrot.lane.b32.xlu1 %v1889_v15, %s2105_s25 }
  0xb1   : > { %1279 = vrot.lane.b32.xlu0 %v1888_v16, %s2105_s25 }
  0xb4   : > { %1273 = vrot.lane.b32.xlu1 %v1887_v18, %s2105_s25 }
  0xb5   : > { %1267 = vrot.lane.b32.xlu0 %v1886_v21, %s2105_s25 }
  0xb8   : > { %1298 = vrot.lane.b32.xlu1 %v1891_v45, %s2105_s25 }
  0xb9   : > { %1291 = vrot.lane.b32.xlu0 %v1890_v46, %s2105_s25 }
  0xbc   : > { %1339 = vrot.lane.b32.xlu1 %v1338_v50, %s2106_s6  ;;  %v1458_v50 = vsel %vm2345_vm2, %v1453_v0, %v1457_v3 }
  0xbd   : > { %1318 = vrot.lane.b32.xlu0 %v1317_v56, %s2106_s6 }
  0xbe   : > { %v740_v4 = vpop.permute.xlu1 %739 }
  0xbf   : > { %v711_v25 = vpop.permute.xlu0 %710  ;;  %742 = vst.msk [vmem:[#allocation2 + $0x10] sm:$0xf] %vm713_vm5, %v740_v4 }
  0xc0   : > { %714 = vst.msk [vmem:[#allocation2] sm:$0xf] %vm713_vm5, %v711_v25  ;;  %1419 = vrot.lane.b32.xlu1 %v1418_v17, %s2106_s6 }
  0xc1   : > { %1399 = vrot.lane.b32.xlu0 %v1398_v40, %s2106_s6 }
  0xc2   : > { %v747_v20 = vpop.permute.xlu1 %746 }
  0xc3   : > { %v719_v39 = vpop.permute.xlu0 %718  ;;  %749 = vst.msk [vmem:[#allocation2 + $0x14] sm:$0xf] %vm713_vm5, %v747_v20 }
  0xc4   : > { %721 = vst.msk [vmem:[#allocation2 + $0x4] sm:$0xf] %vm713_vm5, %v719_v39  ;;  %1379 = vrot.lane.b32.xlu1 %v1378_v10, %s2106_s6 }
  0xc5   : > { %1359 = vrot.lane.b32.xlu0 %v1358_v19, %s2106_s6 }
  0xc6   : > { %v733_v52 = vpop.permute.xlu1 %732 }
  0xc7   : > { %v726_v53 = vpop.permute.xlu0 %725  ;;  %735 = vst.msk [vmem:[#allocation2 + $0xc] sm:$0xf] %vm713_vm5, %v733_v52  ;;  %v1906_v52 = vld [vmem:[%s2790_s3] ss:$0 sm:$0xff] }
  0xc8   : > { %728 = vst.msk [vmem:[#allocation2 + $0x8] sm:$0xf] %vm713_vm5, %v726_v53  ;;  %1459 = vrot.lane.b32.xlu1 %v1458_v50, %s2106_s6 }
  0xc9   : > { %1439 = vrot.lane.b32.xlu0 %v1438_v49, %s2106_s6 }
  0xca   : > { %v761_v56 = vpop.permute.xlu1 %760 }
  0xcb   : > { %v754_v1 = vpop.permute.xlu0 %753  ;;  %763 = vst.msk [vmem:[#allocation2 + $0x1c] sm:$0xf] %vm713_vm5, %v761_v56 }
  0xcc   : > { %756 = vst.msk [vmem:[#allocation2 + $0x18] sm:$0xf] %vm713_vm5, %v754_v1 }
  0xce   : > { %v805_v6 = vpop.permute.xlu1 %804 }
  0xcf   : > { %v784_v17 = vpop.permute.xlu0 %783  ;;  %807 = vst.msk [vmem:[#allocation2 + $0x4] sm:$0xf] %vm786_vm6, %v805_v6 }
  0xd0   : > { %787 = vst.msk [vmem:[#allocation2] sm:$0xf] %vm786_vm6, %v784_v17 }
  0xd2   : > { %v885_v40 = vpop.permute.xlu1 %884 }
  0xd3   : > { %v865_v22 = vpop.permute.xlu0 %864  ;;  %887 = vst.msk [vmem:[#allocation2 + $0x14] sm:$0xf] %vm786_vm6, %v885_v40 }
  0xd4   : > { %867 = vst.msk [vmem:[#allocation2 + $0x10] sm:$0xf] %vm786_vm6, %v865_v22 }
  0xd6   : > { %v845_v35 = vpop.permute.xlu1 %844 }
  0xd7   : > { %v825_v27 = vpop.permute.xlu0 %824  ;;  %847 = vst.msk [vmem:[#allocation2 + $0xc] sm:$0xf] %vm786_vm6, %v845_v35 }
  0xd8   : > { %827 = vst.msk [vmem:[#allocation2 + $0x8] sm:$0xf] %vm786_vm6, %v825_v27 }
  0xda   : > { %v925_v58 = vpop.permute.xlu1 %924 }
  0xdb   : > { %v905_v63 = vpop.permute.xlu0 %904  ;;  %927 = vst.msk [vmem:[#allocation2 + $0x1c] sm:$0xf] %vm786_vm6, %v925_v58 }
  0xdc   : > { %907 = vst.msk [vmem:[#allocation2 + $0x18] sm:$0xf] %vm786_vm6, %v905_v63 }
  0xde   : > { %v940_v26 = vpop.permute.xlu1 %939 }
  0xdf   : > { %v932_v28 = vpop.permute.xlu0 %931  ;;  %942 = vst.msk [vmem:[#allocation2 + $0x4] sm:$0xf] %vm934_vm7, %v940_v26 }
  0xe0   : > { %935 = vst.msk [vmem:[#allocation2] sm:$0xf] %vm934_vm7, %v932_v28 }
  0xe2   : > { %v968_v10 = vpop.permute.xlu1 %967 }
  0xe3   : > { %v961_v23 = vpop.permute.xlu0 %960  ;;  %970 = vst.msk [vmem:[#allocation2 + $0x14] sm:$0xf] %vm934_vm7, %v968_v10 }
  0xe4   : > { %963 = vst.msk [vmem:[#allocation2 + $0x10] sm:$0xf] %vm934_vm7, %v961_v23 }
  0xe6   : > { %v954_v19 = vpop.permute.xlu1 %953 }
  0xe7   : > { %v947_v24 = vpop.permute.xlu0 %946  ;;  %956 = vst.msk [vmem:[#allocation2 + $0xc] sm:$0xf] %vm934_vm7, %v954_v19 }
  0xe8   : > { %949 = vst.msk [vmem:[#allocation2 + $0x8] sm:$0xf] %vm934_vm7, %v947_v24 }
  0xea   : > { %v982_v31 = vpop.permute.xlu1 %981 }
  0xeb   : > { %v975_v32 = vpop.permute.xlu0 %974  ;;  %984 = vst.msk [vmem:[#allocation2 + $0x1c] sm:$0xf] %vm934_vm7, %v982_v31 }
  0xec   : > { %977 = vst.msk [vmem:[#allocation2 + $0x18] sm:$0xf] %vm934_vm7, %v975_v32 }
  0xee   : > { %v997_v33 = vpop.permute.xlu1 %996 }
  0xef   : > { %v989_v36 = vpop.permute.xlu0 %988  ;;  %999 = vst.msk [vmem:[#allocation2 + $0x4] sm:$0xf] %vm991_vm8, %v997_v33 }
  0xf0   : > { %992 = vst.msk [vmem:[#allocation2] sm:$0xf] %vm991_vm8, %v989_v36 }
  0xf2   : > { %v1025_v37 = vpop.permute.xlu1 %1024 }
  0xf3   : > { %v1018_v41 = vpop.permute.xlu0 %1017  ;;  %1027 = vst.msk [vmem:[#allocation2 + $0x14] sm:$0xf] %vm991_vm8, %v1025_v37 }
  0xf4   : > { %1020 = vst.msk [vmem:[#allocation2 + $0x10] sm:$0xf] %vm991_vm8, %v1018_v41 }
  0xf6   : > { %v1011_v42 = vpop.permute.xlu1 %1010 }
  0xf7   : > { %v1004_v43 = vpop.permute.xlu0 %1003  ;;  %1013 = vst.msk [vmem:[#allocation2 + $0xc] sm:$0xf] %vm991_vm8, %v1011_v42 }
  0xf8   : > { %1006 = vst.msk [vmem:[#allocation2 + $0x8] sm:$0xf] %vm991_vm8, %v1004_v43 }
  0xfa   : > { %v1039_v49 = vpop.permute.xlu1 %1038 }
  0xfb   : > { %v1032_v34 = vpop.permute.xlu0 %1031  ;;  %1041 = vst.msk [vmem:[#allocation2 + $0x1c] sm:$0xf] %vm991_vm8, %v1039_v49 }
  0xfc   : > { %1034 = vst.msk [vmem:[#allocation2 + $0x18] sm:$0xf] %vm991_vm8, %v1032_v34 }
  0xfe   : > { %v1080_v59 = vpop.permute.xlu1 %1079 }
  0xff   : > { %v1059_v38 = vpop.permute.xlu0 %1058  ;;  %1082 = vst.msk [vmem:[#allocation2 + $0x4] sm:$0xf] %vm1061_vm9, %v1080_v59 }
 0x100   : > { %1062 = vst.msk [vmem:[#allocation2] sm:$0xf] %vm1061_vm9, %v1059_v38 }
 0x102   : > { %v1160_v7 = vpop.permute.xlu1 %1159 }
 0x103   : > { %v1140_v30 = vpop.permute.xlu0 %1139  ;;  %1162 = vst.msk [vmem:[#allocation2 + $0x14] sm:$0xf] %vm1061_vm9, %v1160_v7 }
 0x104   : > { %1142 = vst.msk [vmem:[#allocation2 + $0x10] sm:$0xf] %vm1061_vm9, %v1140_v30 }
 0x106   : > { %v1120_v8 = vpop.permute.xlu1 %1119 }
 0x107   : > { %v1100_v5 = vpop.permute.xlu0 %1099  ;;  %1122 = vst.msk [vmem:[#allocation2 + $0xc] sm:$0xf] %vm1061_vm9, %v1120_v8 }
 0x108   : > { %1102 = vst.msk [vmem:[#allocation2 + $0x8] sm:$0xf] %vm1061_vm9, %v1100_v5 }
 0x10a   : > { %v1200_v9 = vpop.permute.xlu1 %1199 }
 0x10b   : > { %v1180_v11 = vpop.permute.xlu0 %1179  ;;  %1202 = vst.msk [vmem:[#allocation2 + $0x1c] sm:$0xf] %vm1061_vm9, %v1200_v9 }
 0x10c   : > { %1182 = vst.msk [vmem:[#allocation2 + $0x18] sm:$0xf] %vm1061_vm9, %v1180_v11 }
 0x10e   : > { %v1213_v12 = vpop.permute.xlu1 %1212 }
 0x10f   : > { %v1206_v13 = vpop.permute.xlu0 %1205  ;;  %1215 = vst.msk [vmem:[#allocation2 + $0x4] sm:$0xf] %vm1208_vm10, %v1213_v12 }
 0x110   : > { %1209 = vst.msk [vmem:[#allocation2] sm:$0xf] %vm1208_vm10, %v1206_v13 }
 0x112   : > { %v1237_v14 = vpop.permute.xlu1 %1236 }
 0x113   : > { %v1231_v15 = vpop.permute.xlu0 %1230  ;;  %1239 = vst.msk [vmem:[#allocation2 + $0x14] sm:$0xf] %vm1208_vm10, %v1237_v14 }
 0x114   : > { %1233 = vst.msk [vmem:[#allocation2 + $0x10] sm:$0xf] %vm1208_vm10, %v1231_v15 }
 0x116   : > { %v1225_v16 = vpop.permute.xlu1 %1224 }
 0x117   : > { %v1219_v18 = vpop.permute.xlu0 %1218  ;;  %1227 = vst.msk [vmem:[#allocation2 + $0xc] sm:$0xf] %vm1208_vm10, %v1225_v16 }
 0x118   : > { %1221 = vst.msk [vmem:[#allocation2 + $0x8] sm:$0xf] %vm1208_vm10, %v1219_v18 }
 0x11a   : > { %v1249_v21 = vpop.permute.xlu1 %1248 }
 0x11b   : > { %v1243_v60 = vpop.permute.xlu0 %1242  ;;  %1251 = vst.msk [vmem:[#allocation2 + $0x1c] sm:$0xf] %vm1208_vm10, %v1249_v21 }
 0x11c   : > { %1245 = vst.msk [vmem:[#allocation2 + $0x18] sm:$0xf] %vm1208_vm10, %v1243_v60 }
 0x11e   : > { %v1262_v29 = vpop.permute.xlu1 %1261 }
 0x11f   : > { %v1255_v44 = vpop.permute.xlu0 %1254  ;;  %1264 = vst.msk [vmem:[#allocation2 + $0x4] sm:$0xf] %vm1257_vm11, %v1262_v29 }
 0x120   : > { %1258 = vst.msk [vmem:[#allocation2] sm:$0xf] %vm1257_vm11, %v1255_v44 }
 0x122   : > { %v1286_v45 = vpop.permute.xlu1 %1285 }
 0x123   : > { %v1280_v46 = vpop.permute.xlu0 %1279  ;;  %1288 = vst.msk [vmem:[#allocation2 + $0x14] sm:$0xf] %vm1257_vm11, %v1286_v45 }
 0x124   : > { %1282 = vst.msk [vmem:[#allocation2 + $0x10] sm:$0xf] %vm1257_vm11, %v1280_v46 }
 0x126   : > { %v1274_v51 = vpop.permute.xlu1 %1273 }
 0x127   : > { %v1268_v54 = vpop.permute.xlu0 %1267  ;;  %1276 = vst.msk [vmem:[#allocation2 + $0xc] sm:$0xf] %vm1257_vm11, %v1274_v51 }
 0x128   : > { %1270 = vst.msk [vmem:[#allocation2 + $0x8] sm:$0xf] %vm1257_vm11, %v1268_v54 }
 0x12a   : > { %v1299_v47 = vpop.permute.xlu1 %1298 }
 0x12b   : > { %v1292_v48 = vpop.permute.xlu0 %1291  ;;  %1301 = vst.msk [vmem:[#allocation2 + $0x1c] sm:$0xf] %vm1257_vm11, %v1299_v47 }
 0x12c   : > { %1294 = vst.msk [vmem:[#allocation2 + $0x18] sm:$0xf] %vm1257_vm11, %v1292_v48 }
 0x12e   : > { %v1340_v55 = vpop.permute.xlu1 %1339 }
 0x12f   : > { %v1319_v57 = vpop.permute.xlu0 %1318  ;;  %1342 = vst.msk [vmem:[#allocation2 + $0x4] sm:$0xf] %vm1321_vm12, %v1340_v55 }
 0x130   : > { %1322 = vst.msk [vmem:[#allocation2] sm:$0xf] %vm1321_vm12, %v1319_v57 }
 0x132   : > { %v1420_v61 = vpop.permute.xlu1 %1419 }
 0x133   : > { %v1400_v62 = vpop.permute.xlu0 %1399  ;;  %1422 = vst.msk [vmem:[#allocation2 + $0x14] sm:$0xf] %vm1321_vm12, %v1420_v61 }
 0x134   : > { %1402 = vst.msk [vmem:[#allocation2 + $0x10] sm:$0xf] %vm1321_vm12, %v1400_v62 }
 0x136   : > { %v1380_v2 = vpop.permute.xlu1 %1379 }
 0x137   : > { %v1360_v4 = vpop.permute.xlu0 %1359  ;;  %v2034_v25 = vld [vmem:[#allocation2] sm:$0xff]   ;;  %1382 = vst.msk [vmem:[#allocation2 + $0xc] sm:$0xf] %vm1321_vm12, %v1380_v2 }
 0x138   : > { %1362 = vst.msk [vmem:[#allocation2 + $0x8] sm:$0xf] %vm1321_vm12, %v1360_v4  ;;  %1935 = vmatprep.mubr.msk.bf16.mxu0 %vm1518_vm13, %v2034_v25 }
 0x13a   : > { %v1460_v0 = vpop.permute.xlu1 %1459 }
 0x13b   : > { %v1440_v3 = vpop.permute.xlu0 %1439  ;;  %v2036_v20 = vld [vmem:[#allocation2 + $0x10] sm:$0xff]   ;;  %1462 = vst.msk [vmem:[#allocation2 + $0x1c] sm:$0xf] %vm1321_vm12, %v1460_v0 }
 0x13c   : > { %1442 = vst.msk [vmem:[#allocation2 + $0x18] sm:$0xf] %vm1321_vm12, %v1440_v3  ;;  %1939 = vmatprep.mubr.msk.bf16.mxu1 %vm1518_vm13, %v2036_v20 }
 0x13f   : > { %v2037_v39 = vld [vmem:[#allocation2 + $0x8] sm:$0xff]  }
 0x140   : > { %1936 = vmatmul.mubr.msk.bf16.vlgmr.msra.gmra.mxu0 %vm1518_vm13, %v2037_v39 }
 0x143   : > { %v2038_v50 = vld [vmem:[#allocation2 + $0x18] sm:$0xff]  }
 0x144   : > { %1940 = vmatmul.mubr.msk.bf16.vlgmr.msra.gmra.mxu1 %vm1518_vm13, %v2038_v50 }
 0x200   : > { %v1937_v53 = vpop.f32.mrf.mxu0 }
 0x201   : > { %v1578_v56 = vadd.f32 %v1937_v53, %v1906_v52 }
 0x202   : > { %v1569_v1 = vpop.f32.mrf.mxu0 }
 0x203   : > { %v1602_v6 = vmul.f32 0.2, %v1578_v56  ;;  %v1570_v17 = vadd.f32 %v1906_v52, %v1569_v1 }
 0x204   : > { %v1938_v40 = vpop.f32.mrf.mxu0  ;;  %v1941_v22 = vpop.f32.mrf.mxu1 }
 0x205   : > { %v1610_v35 = vmax.f32 %v1578_v56, %v1602_v6  ;;  %v1600_v27 = vmul.f32 0.2, %v1570_v17  ;;  %v1581_v58 = vadd.f32 %v1938_v40, %v1906_v52  ;;  %v1594_v63 = vadd.f32 %v1941_v22, %v1906_v52 }
 0x206   : > { %v1572_v26 = vpop.f32.mrf.mxu0  ;;  %v1585_v28 = vpop.f32.mrf.mxu1 }
 0x207   : > { %1619 = vst.msk [vmem:[%s2754_s12 + $0x10] sm:$0xff] %vm1616_vm14, %v1610_v35  ;;  %v1608_v10 = vmax.f32 %v1570_v17, %v1600_v27  ;;  %v1603_v23 = vmul.f32 0.2, %v1581_v58  ;;  %v1606_v19 = vmul.f32 0.2, %v1594_v63  ;;  %v1573_v24 = vadd.f32 %v1906_v52, %v1572_v26 }
 0x208   : > { %v1586_v31 = vadd.f32 %v1906_v52, %v1585_v28  ;;  %v1942_v32 = vpop.f32.mrf.mxu1 }
 0x209   : > { %1617 = vst.msk [vmem:[%s2754_s12] sm:$0xff] %vm1616_vm14, %v1608_v10  ;;  %v1611_v33 = vmax.f32 %v1581_v58, %v1603_v23  ;;  %v1614_v36 = vmax.f32 %v1594_v63, %v1606_v19  ;;  %v1601_v37 = vmul.f32 0.2, %v1573_v24  ;;  %v1597_v41 = vadd.f32 %v1942_v32, %v1906_v52 }
 0x20a   : > { %v1604_v42 = vmul.f32 0.2, %v1586_v31  ;;  %v1588_v43 = vpop.f32.mrf.mxu1 }
 0x20b   : > { %1620 = vst.msk [vmem:[%s2754_s12 + $0x18] sm:$0xff] %vm1616_vm14, %v1611_v33  ;;  %1623 = vst.msk [vmem:[%s2754_s12 + $0x30] sm:$0xff] %vm1616_vm14, %v1614_v36  ;;  %v1609_v49 = vmax.f32 %v1573_v24, %v1601_v37  ;;  %v1607_v34 = vmul.f32 0.2, %v1597_v41  ;;  %v1589_v59 = vadd.f32 %v1906_v52, %v1588_v43 }
 0x20c   : > { %v1612_v38 = vmax.f32 %v1586_v31, %v1604_v42 }
 0x20d   : > { %1618 = vst.msk [vmem:[%s2754_s12 + $0x8] sm:$0xff] %vm1616_vm14, %v1609_v49  ;;  %v1615_v7 = vmax.f32 %v1597_v41, %v1607_v34  ;;  %v1605_v30 = vmul.f32 0.2, %v1589_v59 }
 0x20e   : > { %1621 = vst.msk [vmem:[%s2754_s12 + $0x20] sm:$0xff] %vm1616_vm14, %v1612_v38 }
 0x20f   : > { %1624 = vst.msk [vmem:[%s2754_s12 + $0x38] sm:$0xff] %vm1616_vm14, %v1615_v7  ;;  %v1613_v8 = vmax.f32 %v1589_v59, %v1605_v30 }
 0x211   : > { %1622 = vst.msk [vmem:[%s2754_s12 + $0x28] sm:$0xff] %vm1616_vm14, %v1613_v8 }
 0x212 PF: > { %s14_s19 = sadd.s32 1, %s2093_s19   ;;  %s2794_s15 = smov %s2081_s16 }
 0x213   : > { %p11_p11 = scmp.ge.s32.totalorder %s14_s19, 4   ;;  %s2795_s16 = smov %s2167_s23 }
 0x214   : > { %s2796_s17 = smov %s2089_s18  ;;  %s2797_s18 = smov %s2799_s20 }
 0x215   :  { %13 = sbr.rel (!%p11_p11) target bundleno = 3 (0x3), region = 204 }

</bundles_post_ra>
